<compile_context>
chip_gen: v6e
topology: v6e:2x2x1
jax: 0.10.0
libtpu: 0.0.40
codegen_flags: <defaults>
</compile_context>

<pallas_src>
import math
import jax
import jax.numpy as jnp
from jax.experimental import pallas as pl
from jax.experimental.pallas import tpu as pltpu

_LOG2PI = math.log(2.0 * math.pi)


# ---------------------------------------------------------------------------
# Fused kernel: conv3x3+ReLU -> {avgpool+fc, flow+logprob}  (one batch element / step)
# ---------------------------------------------------------------------------
def _make_dhm_kernel(H, W, Cin_p, Cout, NCLS):
    def kernel(xr_ref,      # (Hp, Cin_p, Wp)   padded input, layout (row, chan, col)
               wk_ref,      # (Cout, 9*Cin_p)   tap-major conv weights
               bconv_ref,   # (Cout, 1)
               wfc_ref,     # (Cout, NCLS)
               bfc_ref,     # (1, NCLS)
               ls_ref,      # (Cout, H*W)       flow log-scale, NCHW flatten order
               t_ref,       # (Cout, H*W)       flow shift,     NCHW flatten order
               sls_ref,     # (1, 1)            precomputed sum(log_s)
               y_ref,       # (1, NCLS)
               logpz_ref,   # (1, 1)
               logdet_ref,  # (1, 1)
               z_ref,       # (Cout, H*W)       lane-dense NCHW-ordered z
               patch_ref,   # VMEM (H, 9*Cin_p, W) scratch
               feat_ref):   # VMEM (Cout, H*W)     scratch
        # --- conv3x3 (stride 1, pad 1): gather the 9 taps in VMEM (no HBM im2col) ---
        for di in range(3):
            for dj in range(3):
                tap = di * 3 + dj
                patch_ref[:, pl.ds(tap * Cin_p, Cin_p), :] = (
                    xr_ref[pl.ds(di, H), :, pl.ds(dj, W)])

        # one (Cout, 9*Cin_p) @ (9*Cin_p, W) MXU matmul per output row -> channel-major features
        wk = wk_ref[...]                                   # hoisted out of the loop
        for h in range(H):
            feat_ref[:, pl.ds(h * W, W)] = jnp.dot(
                wk, patch_ref[h], preferred_element_type=jnp.float32)

        f = jnp.maximum(feat_ref[...] + bconv_ref[...], 0.0)        # (Cout, H*W), ReLU

        # --- head: AdaptiveAvgPool2d((1,1)) + fc (tiny, pure epilogue) ---
        pooled = jnp.mean(f, axis=1, keepdims=True)                  # (Cout, 1)
        y_ref[...] = (jnp.sum(pooled * wfc_ref[...], axis=0, keepdims=True)
                      + bfc_ref[...])                                # (1, NCLS)

        # --- flow (elementwise affine) + standard_normal_logprob(z).sum ---
        z = f * jnp.exp(ls_ref[...]) + t_ref[...]                    # (Cout, H*W)
        z_ref[...] = z
        lp = jnp.sum(-0.5 * _LOG2PI - 0.5 * z * z, axis=1, keepdims=True)   # (Cout, 1)
        logpz_ref[...] = jnp.sum(lp, axis=0, keepdims=True)          # (1, 1)
        logdet_ref[...] = sls_ref[...]        # init_probs == 0 + precomputed sum(log_s)

    return kernel


# ---------------------------------------------------------------------------
# Full DHM_iresflows.forward (default flags, inverse=False, return_features=False)
# ---------------------------------------------------------------------------
def dhm_forward(x, params):
    B, Cin, H, W = x.shape
    conv_w, conv_b = params["conv_w"], params["conv_b"]
    fc_w, fc_b = params["fc_w"], params["fc_b"]
    log_s, t = params["flow_log_s"], params["flow_t"]
    Cout = conv_w.shape[0]
    NCLS = fc_w.shape[0]
    HW = H * W
    Hp, Wp = H + 2, W + 2
    Cin_p = max(8, ((Cin + 7) // 8) * 8)          # sublane-align the channel axis
    f32 = jnp.float32

    # --- parameter / input prep (all O(input or param) work, done once under jit) ---
    xq = jnp.pad(x.astype(f32), ((0, 0), (0, Cin_p - Cin), (1, 1), (1, 1)))  # (B,Cin_p,Hp,Wp)
    xr = jnp.transpose(xq, (0, 2, 1, 3))                                      # (B,Hp,Cin_p,Wp)
    wq = jnp.pad(conv_w.astype(f32), ((0, 0), (0, Cin_p - Cin), (0, 0), (0, 0)))
    wk = jnp.transpose(wq, (0, 2, 3, 1)).reshape(Cout, 9 * Cin_p)             # tap-major
    bconv = conv_b.astype(f32).reshape(Cout, 1)
    wfc_t = fc_w.astype(f32).T                                                # (Cout, NCLS)
    bfc = fc_b.astype(f32).reshape(1, NCLS)
    ls2 = log_s.astype(f32).reshape(Cout, HW)        # NCHW flatten order == torch .view(B,-1)
    t2 = t.astype(f32).reshape(Cout, HW)
    sls = jnp.sum(log_s.astype(f32)).reshape(1, 1)   # hoisted sum(log_s) for logdet

    kernel = _make_dhm_kernel(H, W, Cin_p, Cout, NCLS)
    const = lambda b: (0, 0)                         # resident weight/param blocks

    y3, lp3, ld3, z3 = pl.pallas_call(
        kernel,
        out_shape=(
            jax.ShapeDtypeStruct((B, 1, NCLS), f32),
            jax.ShapeDtypeStruct((B, 1, 1), f32),
            jax.ShapeDtypeStruct((B, 1, 1), f32),
            jax.ShapeDtypeStruct((B, Cout, HW), f32),
        ),
        grid=(B,),
        in_specs=[
            pl.BlockSpec((None, Hp, Cin_p, Wp), lambda b: (b, 0, 0, 0)),
            pl.BlockSpec((Cout, 9 * Cin_p), const),
            pl.BlockSpec((Cout, 1), const),
            pl.BlockSpec((Cout, NCLS), const),
            pl.BlockSpec((1, NCLS), const),
            pl.BlockSpec((Cout, HW), const),
            pl.BlockSpec((Cout, HW), const),
            pl.BlockSpec((1, 1), const),
        ],
        out_specs=(
            pl.BlockSpec((None, 1, NCLS), lambda b: (b, 0, 0)),
            pl.BlockSpec((None, 1, 1), lambda b: (b, 0, 0)),
            pl.BlockSpec((None, 1, 1), lambda b: (b, 0, 0)),
            pl.BlockSpec((None, Cout, HW), lambda b: (b, 0, 0)),
        ),
        scratch_shapes=[
            pltpu.VMEM((H, 9 * Cin_p, W), f32),      # tap patch buffer
            pltpu.VMEM((Cout, HW), f32),             # channel-major features
        ],
        compiler_params=pltpu.CompilerParams(
            dimension_semantics=("parallel",)),      # batch axis shardable across TCs
    )(xr, wk, bconv, wfc_t, bfc, ls2, t2, sls)

    y = y3[:, 0, :]                                  # (B, NCLS)
    logpz = lp3[:, 0, :]                             # (B, 1)
    logdet = ld3[:, 0, :]                            # (B, 1)
    z = z3.reshape(B, Cout * HW)                     # exact NCHW flatten order, free reshape
    return y, logpz, logdet, z, None


# ---------------------------------------------------------------------------
# Pure-JAX reference (silent sanity check)
# ---------------------------------------------------------------------------
def _reference(x, p):
    feats = jax.lax.conv_general_dilated(
        x, p["conv_w"], (1, 1), "SAME",
        dimension_numbers=("NCHW", "OIHW", "NCHW"))
    feats = jnp.maximum(feats + p["conv_b"][None, :, None, None], 0.0)
    B = x.shape[0]
    nf_flat = feats.reshape(B, -1)
    z = nf_flat * jnp.exp(p["flow_log_s"])[None, :] + p["flow_t"][None, :]
    logdet = jnp.zeros((B, 1)) + jnp.sum(p["flow_log_s"])
    logpz = jnp.sum(-0.5 * _LOG2PI - 0.5 * z * z, axis=1, keepdims=True)
    pooled = jnp.mean(feats, axis=(2, 3))
    y = pooled @ p["fc_w"].T + p["fc_b"][None, :]
    return y, logpz, logdet, z


if __name__ == "__main__":
    # Small shapes: batch=2, in-channels=3, spatial=16x16, backbone width=8, 10 classes.
    B, Cin, H, W = 2, 3, 16, 16
    Cout, NCLS = 8, 10
    D = Cout * H * W

    key = jax.random.PRNGKey(0)
    ks = jax.random.split(key, 7)
    params = {
        "conv_w":     0.1 * jax.random.normal(ks[0], (Cout, Cin, 3, 3), jnp.float32),
        "conv_b":     0.1 * jax.random.normal(ks[1], (Cout,), jnp.float32),
        "fc_w":       0.1 * jax.random.normal(ks[2], (NCLS, Cout), jnp.float32),
        "fc_b":       0.1 * jax.random.normal(ks[3], (NCLS,), jnp.float32),
        "flow_log_s": 0.01 * jax.random.normal(ks[4], (D,), jnp.float32),
        "flow_t":     0.01 * jax.random.normal(ks[5], (D,), jnp.float32),
    }
    x = jax.random.normal(ks[6], (B, Cin, H, W), jnp.float32)

    y, logpz, logdet, z, _ = jax.jit(dhm_forward)(x, params)
    jax.block_until_ready((y, logpz, logdet, z))

    # silent correctness check vs pure-JAX reference
    y_r, lp_r, ld_r, z_r = _reference(x, params)
    assert jnp.allclose(y, y_r, rtol=2e-3, atol=2e-3)
    assert jnp.allclose(logpz, lp_r, rtol=2e-3, atol=2e-3)
    assert jnp.allclose(logdet, ld_r, rtol=2e-3, atol=2e-3)
    assert jnp.allclose(z, z_r, rtol=2e-3, atol=2e-3)
    assert y.shape == (B, NCLS) and logpz.shape == (B, 1)
    assert logdet.shape == (B, 1) and z.shape == (B, D)

    print("KERNEL_OK")
</pallas_src>

<mosaic_0001>
module attributes {stable_mosaic.version = 11 : i64} {
  func.func @kernel(%arg0: i32, %arg1: memref<1x18x8x18xf32, #tpu.memory_space<vmem>>, %arg2: memref<8x72xf32, #tpu.memory_space<vmem>>, %arg3: memref<8x1xf32, #tpu.memory_space<vmem>>, %arg4: memref<8x10xf32, #tpu.memory_space<vmem>>, %arg5: memref<1x10xf32, #tpu.memory_space<vmem>>, %arg6: memref<8x256xf32, #tpu.memory_space<vmem>>, %arg7: memref<8x256xf32, #tpu.memory_space<vmem>>, %arg8: memref<1x1xf32, #tpu.memory_space<vmem>>, %arg9: memref<1x1x10xf32, #tpu.memory_space<vmem>>, %arg10: memref<1x1x1xf32, #tpu.memory_space<vmem>>, %arg11: memref<1x1x1xf32, #tpu.memory_space<vmem>>, %arg12: memref<1x8x256xf32, #tpu.memory_space<vmem>>, %arg13: memref<16x72x16xf32, #tpu.memory_space<vmem>>, %arg14: memref<8x256xf32, #tpu.memory_space<vmem>>) attributes {dimension_semantics = [#tpu.dimension_semantics<parallel>], iteration_bounds = array<i64: 2>, scalar_prefetch = 0 : i64, scratch_operands = 2 : i64, tpu.core_type = #tpu.core_type<tc>, window_params = [{transform_indices = @transform_0, window_bounds = array<i64: 1, 18, 8, 18>}, {pipeline_mode = #tpu.pipeline_mode<synchronous>, transform_indices = @transform_1, window_bounds = array<i64: 8, 72>}, {pipeline_mode = #tpu.pipeline_mode<synchronous>, transform_indices = @transform_2, window_bounds = array<i64: 8, 1>}, {pipeline_mode = #tpu.pipeline_mode<synchronous>, transform_indices = @transform_3, window_bounds = array<i64: 8, 10>}, {pipeline_mode = #tpu.pipeline_mode<synchronous>, transform_indices = @transform_4, window_bounds = array<i64: 1, 10>}, {pipeline_mode = #tpu.pipeline_mode<synchronous>, transform_indices = @transform_5, window_bounds = array<i64: 8, 256>}, {pipeline_mode = #tpu.pipeline_mode<synchronous>, transform_indices = @transform_6, window_bounds = array<i64: 8, 256>}, {pipeline_mode = #tpu.pipeline_mode<synchronous>, transform_indices = @transform_7, window_bounds = array<i64: 1, 1>}, {transform_indices = @transform_8, window_bounds = array<i64: 1, 1, 10>}, {transform_indices = @transform_9, window_bounds = array<i64: 1, 1, 1>}, {transform_indices = @transform_10, window_bounds = array<i64: 1, 1, 1>}, {transform_indices = @transform_11, window_bounds = array<i64: 1, 8, 256>}]} {
    %c0 = arith.constant 0 : index
    %c0_0 = arith.constant 0 : index
    %c0_1 = arith.constant 0 : index
    %c0_2 = arith.constant 0 : index
    %0 = vector.load %arg1[%c0, %c0_0, %c0_1, %c0_2] : memref<1x18x8x18xf32, #tpu.memory_space<vmem>>, vector<1x16x8x16xf32>
    %1 = vector.shape_cast %0 : vector<1x16x8x16xf32> to vector<16x8x16xf32>
    %c0_3 = arith.constant 0 : index
    %c0_4 = arith.constant 0 : index
    %c0_5 = arith.constant 0 : index
    %2 = vector.load %arg13[%c0_3, %c0_4, %c0_5] : memref<16x72x16xf32, #tpu.memory_space<vmem>>, vector<16x8x16xf32>
    tpu.vector_store %arg13[%c0_3, %c0_4, %c0_5], %1 {strides = array<i32>} : memref<16x72x16xf32, #tpu.memory_space<vmem>>, vector<16x8x16xf32>,
    %c0_6 = arith.constant 0 : index
    %c0_7 = arith.constant 0 : index
    %c0_8 = arith.constant 0 : index
    %c1 = arith.constant 1 : index
    %3 = vector.load %arg1[%c0_6, %c0_7, %c0_8, %c1] : memref<1x18x8x18xf32, #tpu.memory_space<vmem>>, vector<1x16x8x16xf32>
    %4 = vector.shape_cast %3 : vector<1x16x8x16xf32> to vector<16x8x16xf32>
    %c0_9 = arith.constant 0 : index
    %c8 = arith.constant 8 : index
    %c0_10 = arith.constant 0 : index
    %5 = vector.load %arg13[%c0_9, %c8, %c0_10] : memref<16x72x16xf32, #tpu.memory_space<vmem>>, vector<16x8x16xf32>
    tpu.vector_store %arg13[%c0_9, %c8, %c0_10], %4 {strides = array<i32>} : memref<16x72x16xf32, #tpu.memory_space<vmem>>, vector<16x8x16xf32>,
    %c0_11 = arith.constant 0 : index
    %c0_12 = arith.constant 0 : index
    %c0_13 = arith.constant 0 : index
    %c2 = arith.constant 2 : index
    %6 = vector.load %arg1[%c0_11, %c0_12, %c0_13, %c2] : memref<1x18x8x18xf32, #tpu.memory_space<vmem>>, vector<1x16x8x16xf32>
    %7 = vector.shape_cast %6 : vector<1x16x8x16xf32> to vector<16x8x16xf32>
    %c0_14 = arith.constant 0 : index
    %c16 = arith.constant 16 : index
    %c0_15 = arith.constant 0 : index
    %8 = vector.load %arg13[%c0_14, %c16, %c0_15] : memref<16x72x16xf32, #tpu.memory_space<vmem>>, vector<16x8x16xf32>
    tpu.vector_store %arg13[%c0_14, %c16, %c0_15], %7 {strides = array<i32>} : memref<16x72x16xf32, #tpu.memory_space<vmem>>, vector<16x8x16xf32>,
    %c0_16 = arith.constant 0 : index
    %c1_17 = arith.constant 1 : index
    %c0_18 = arith.constant 0 : index
    %c0_19 = arith.constant 0 : index
    %9 = vector.load %arg1[%c0_16, %c1_17, %c0_18, %c0_19] : memref<1x18x8x18xf32, #tpu.memory_space<vmem>>, vector<1x16x8x16xf32>
    %10 = vector.shape_cast %9 : vector<1x16x8x16xf32> to vector<16x8x16xf32>
    %c0_20 = arith.constant 0 : index
    %c24 = arith.constant 24 : index
    %c0_21 = arith.constant 0 : index
    %11 = vector.load %arg13[%c0_20, %c24, %c0_21] : memref<16x72x16xf32, #tpu.memory_space<vmem>>, vector<16x8x16xf32>
    tpu.vector_store %arg13[%c0_20, %c24, %c0_21], %10 {strides = array<i32>} : memref<16x72x16xf32, #tpu.memory_space<vmem>>, vector<16x8x16xf32>,
    %c0_22 = arith.constant 0 : index
    %c1_23 = arith.constant 1 : index
    %c0_24 = arith.constant 0 : index
    %c1_25 = arith.constant 1 : index
    %12 = vector.load %arg1[%c0_22, %c1_23, %c0_24, %c1_25] : memref<1x18x8x18xf32, #tpu.memory_space<vmem>>, vector<1x16x8x16xf32>
    %13 = vector.shape_cast %12 : vector<1x16x8x16xf32> to vector<16x8x16xf32>
    %c0_26 = arith.constant 0 : index
    %c32 = arith.constant 32 : index
    %c0_27 = arith.constant 0 : index
    %14 = vector.load %arg13[%c0_26, %c32, %c0_27] : memref<16x72x16xf32, #tpu.memory_space<vmem>>, vector<16x8x16xf32>
    tpu.vector_store %arg13[%c0_26, %c32, %c0_27], %13 {strides = array<i32>} : memref<16x72x16xf32, #tpu.memory_space<vmem>>, vector<16x8x16xf32>,
    %c0_28 = arith.constant 0 : index
    %c1_29 = arith.constant 1 : index
    %c0_30 = arith.constant 0 : index
    %c2_31 = arith.constant 2 : index
    %15 = vector.load %arg1[%c0_28, %c1_29, %c0_30, %c2_31] : memref<1x18x8x18xf32, #tpu.memory_space<vmem>>, vector<1x16x8x16xf32>
    %16 = vector.shape_cast %15 : vector<1x16x8x16xf32> to vector<16x8x16xf32>
    %c0_32 = arith.constant 0 : index
    %c40 = arith.constant 40 : index
    %c0_33 = arith.constant 0 : index
    %17 = vector.load %arg13[%c0_32, %c40, %c0_33] : memref<16x72x16xf32, #tpu.memory_space<vmem>>, vector<16x8x16xf32>
    tpu.vector_store %arg13[%c0_32, %c40, %c0_33], %16 {strides = array<i32>} : memref<16x72x16xf32, #tpu.memory_space<vmem>>, vector<16x8x16xf32>,
    %c0_34 = arith.constant 0 : index
    %c2_35 = arith.constant 2 : index
    %c0_36 = arith.constant 0 : index
    %c0_37 = arith.constant 0 : index
    %18 = vector.load %arg1[%c0_34, %c2_35, %c0_36, %c0_37] : memref<1x18x8x18xf32, #tpu.memory_space<vmem>>, vector<1x16x8x16xf32>
    %19 = vector.shape_cast %18 : vector<1x16x8x16xf32> to vector<16x8x16xf32>
    %c0_38 = arith.constant 0 : index
    %c48 = arith.constant 48 : index
    %c0_39 = arith.constant 0 : index
    %20 = vector.load %arg13[%c0_38, %c48, %c0_39] : memref<16x72x16xf32, #tpu.memory_space<vmem>>, vector<16x8x16xf32>
    tpu.vector_store %arg13[%c0_38, %c48, %c0_39], %19 {strides = array<i32>} : memref<16x72x16xf32, #tpu.memory_space<vmem>>, vector<16x8x16xf32>,
    %c0_40 = arith.constant 0 : index
    %c2_41 = arith.constant 2 : index
    %c0_42 = arith.constant 0 : index
    %c1_43 = arith.constant 1 : index
    %21 = vector.load %arg1[%c0_40, %c2_41, %c0_42, %c1_43] : memref<1x18x8x18xf32, #tpu.memory_space<vmem>>, vector<1x16x8x16xf32>
    %22 = vector.shape_cast %21 : vector<1x16x8x16xf32> to vector<16x8x16xf32>
    %c0_44 = arith.constant 0 : index
    %c56 = arith.constant 56 : index
    %c0_45 = arith.constant 0 : index
    %23 = vector.load %arg13[%c0_44, %c56, %c0_45] : memref<16x72x16xf32, #tpu.memory_space<vmem>>, vector<16x8x16xf32>
    tpu.vector_store %arg13[%c0_44, %c56, %c0_45], %22 {strides = array<i32>} : memref<16x72x16xf32, #tpu.memory_space<vmem>>, vector<16x8x16xf32>,
    %c0_46 = arith.constant 0 : index
    %c2_47 = arith.constant 2 : index
    %c0_48 = arith.constant 0 : index
    %c2_49 = arith.constant 2 : index
    %24 = vector.load %arg1[%c0_46, %c2_47, %c0_48, %c2_49] : memref<1x18x8x18xf32, #tpu.memory_space<vmem>>, vector<1x16x8x16xf32>
    %25 = vector.shape_cast %24 : vector<1x16x8x16xf32> to vector<16x8x16xf32>
    %c0_50 = arith.constant 0 : index
    %c64 = arith.constant 64 : index
    %c0_51 = arith.constant 0 : index
    %26 = vector.load %arg13[%c0_50, %c64, %c0_51] : memref<16x72x16xf32, #tpu.memory_space<vmem>>, vector<16x8x16xf32>
    tpu.vector_store %arg13[%c0_50, %c64, %c0_51], %25 {strides = array<i32>} : memref<16x72x16xf32, #tpu.memory_space<vmem>>, vector<16x8x16xf32>,
    %c0_52 = arith.constant 0 : index
    %c0_53 = arith.constant 0 : index
    %27 = vector.load %arg2[%c0_52, %c0_53] : memref<8x72xf32, #tpu.memory_space<vmem>>, vector<8x72xf32>
    %c0_54 = arith.constant 0 : index
    %c0_55 = arith.constant 0 : index
    %c0_56 = arith.constant 0 : index
    %28 = vector.load %arg13[%c0_54, %c0_55, %c0_56] : memref<16x72x16xf32, #tpu.memory_space<vmem>>, vector<1x72x16xf32>
    %29 = vector.shape_cast %28 : vector<1x72x16xf32> to vector<72x16xf32>
    %cst = arith.constant dense<0.000000e+00> : vector<8x16xf32>
    %30 = tpu.matmul %27, %29, %cst {dimension_numbers = #tpu.dot_dimension_numbers<[1], [0], [0], [1], [0, 0, 1, 1], [], []>} : vector<8x72xf32>, vector<72x16xf32>, vector<8x16xf32> -> vector<8x16xf32>
    %c0_57 = arith.constant 0 : index
    %c0_58 = arith.constant 0 : index
    %31 = vector.load %arg14[%c0_57, %c0_58] : memref<8x256xf32, #tpu.memory_space<vmem>>, vector<8x16xf32>
    tpu.vector_store %arg14[%c0_57, %c0_58], %30 {strides = array<i32>} : memref<8x256xf32, #tpu.memory_space<vmem>>, vector<8x16xf32>,
    %c1_59 = arith.constant 1 : index
    %c0_60 = arith.constant 0 : index
    %c0_61 = arith.constant 0 : index
    %32 = vector.load %arg13[%c1_59, %c0_60, %c0_61] : memref<16x72x16xf32, #tpu.memory_space<vmem>>, vector<1x72x16xf32>
    %33 = vector.shape_cast %32 : vector<1x72x16xf32> to vector<72x16xf32>
    %cst_62 = arith.constant dense<0.000000e+00> : vector<8x16xf32>
    %34 = tpu.matmul %27, %33, %cst_62 {dimension_numbers = #tpu.dot_dimension_numbers<[1], [0], [0], [1], [0, 0, 1, 1], [], []>} : vector<8x72xf32>, vector<72x16xf32>, vector<8x16xf32> -> vector<8x16xf32>
    %c0_63 = arith.constant 0 : index
    %c16_64 = arith.constant 16 : index
    %35 = vector.load %arg14[%c0_63, %c16_64] : memref<8x256xf32, #tpu.memory_space<vmem>>, vector<8x16xf32>
    tpu.vector_store %arg14[%c0_63, %c16_64], %34 {strides = array<i32>} : memref<8x256xf32, #tpu.memory_space<vmem>>, vector<8x16xf32>,
    %c2_65 = arith.constant 2 : index
    %c0_66 = arith.constant 0 : index
    %c0_67 = arith.constant 0 : index
    %36 = vector.load %arg13[%c2_65, %c0_66, %c0_67] : memref<16x72x16xf32, #tpu.memory_space<vmem>>, vector<1x72x16xf32>
    %37 = vector.shape_cast %36 : vector<1x72x16xf32> to vector<72x16xf32>
    %cst_68 = arith.constant dense<0.000000e+00> : vector<8x16xf32>
    %38 = tpu.matmul %27, %37, %cst_68 {dimension_numbers = #tpu.dot_dimension_numbers<[1], [0], [0], [1], [0, 0, 1, 1], [], []>} : vector<8x72xf32>, vector<72x16xf32>, vector<8x16xf32> -> vector<8x16xf32>
    %c0_69 = arith.constant 0 : index
    %c32_70 = arith.constant 32 : index
    %39 = vector.load %arg14[%c0_69, %c32_70] : memref<8x256xf32, #tpu.memory_space<vmem>>, vector<8x16xf32>
    tpu.vector_store %arg14[%c0_69, %c32_70], %38 {strides = array<i32>} : memref<8x256xf32, #tpu.memory_space<vmem>>, vector<8x16xf32>,
    %c3 = arith.constant 3 : index
    %c0_71 = arith.constant 0 : index
    %c0_72 = arith.constant 0 : index
    %40 = vector.load %arg13[%c3, %c0_71, %c0_72] : memref<16x72x16xf32, #tpu.memory_space<vmem>>, vector<1x72x16xf32>
    %41 = vector.shape_cast %40 : vector<1x72x16xf32> to vector<72x16xf32>
    %cst_73 = arith.constant dense<0.000000e+00> : vector<8x16xf32>
    %42 = tpu.matmul %27, %41, %cst_73 {dimension_numbers = #tpu.dot_dimension_numbers<[1], [0], [0], [1], [0, 0, 1, 1], [], []>} : vector<8x72xf32>, vector<72x16xf32>, vector<8x16xf32> -> vector<8x16xf32>
    %c0_74 = arith.constant 0 : index
    %c48_75 = arith.constant 48 : index
    %43 = vector.load %arg14[%c0_74, %c48_75] : memref<8x256xf32, #tpu.memory_space<vmem>>, vector<8x16xf32>
    tpu.vector_store %arg14[%c0_74, %c48_75], %42 {strides = array<i32>} : memref<8x256xf32, #tpu.memory_space<vmem>>, vector<8x16xf32>,
    %c4 = arith.constant 4 : index
    %c0_76 = arith.constant 0 : index
    %c0_77 = arith.constant 0 : index
    %44 = vector.load %arg13[%c4, %c0_76, %c0_77] : memref<16x72x16xf32, #tpu.memory_space<vmem>>, vector<1x72x16xf32>
    %45 = vector.shape_cast %44 : vector<1x72x16xf32> to vector<72x16xf32>
    %cst_78 = arith.constant dense<0.000000e+00> : vector<8x16xf32>
    %46 = tpu.matmul %27, %45, %cst_78 {dimension_numbers = #tpu.dot_dimension_numbers<[1], [0], [0], [1], [0, 0, 1, 1], [], []>} : vector<8x72xf32>, vector<72x16xf32>, vector<8x16xf32> -> vector<8x16xf32>
    %c0_79 = arith.constant 0 : index
    %c64_80 = arith.constant 64 : index
    %47 = vector.load %arg14[%c0_79, %c64_80] : memref<8x256xf32, #tpu.memory_space<vmem>>, vector<8x16xf32>
    tpu.vector_store %arg14[%c0_79, %c64_80], %46 {strides = array<i32>} : memref<8x256xf32, #tpu.memory_space<vmem>>, vector<8x16xf32>,
    %c5 = arith.constant 5 : index
    %c0_81 = arith.constant 0 : index
    %c0_82 = arith.constant 0 : index
    %48 = vector.load %arg13[%c5, %c0_81, %c0_82] : memref<16x72x16xf32, #tpu.memory_space<vmem>>, vector<1x72x16xf32>
    %49 = vector.shape_cast %48 : vector<1x72x16xf32> to vector<72x16xf32>
    %cst_83 = arith.constant dense<0.000000e+00> : vector<8x16xf32>
    %50 = tpu.matmul %27, %49, %cst_83 {dimension_numbers = #tpu.dot_dimension_numbers<[1], [0], [0], [1], [0, 0, 1, 1], [], []>} : vector<8x72xf32>, vector<72x16xf32>, vector<8x16xf32> -> vector<8x16xf32>
    %c0_84 = arith.constant 0 : index
    %c80 = arith.constant 80 : index
    %51 = vector.load %arg14[%c0_84, %c80] : memref<8x256xf32, #tpu.memory_space<vmem>>, vector<8x16xf32>
    tpu.vector_store %arg14[%c0_84, %c80], %50 {strides = array<i32>} : memref<8x256xf32, #tpu.memory_space<vmem>>, vector<8x16xf32>,
    %c6 = arith.constant 6 : index
    %c0_85 = arith.constant 0 : index
    %c0_86 = arith.constant 0 : index
    %52 = vector.load %arg13[%c6, %c0_85, %c0_86] : memref<16x72x16xf32, #tpu.memory_space<vmem>>, vector<1x72x16xf32>
    %53 = vector.shape_cast %52 : vector<1x72x16xf32> to vector<72x16xf32>
    %cst_87 = arith.constant dense<0.000000e+00> : vector<8x16xf32>
    %54 = tpu.matmul %27, %53, %cst_87 {dimension_numbers = #tpu.dot_dimension_numbers<[1], [0], [0], [1], [0, 0, 1, 1], [], []>} : vector<8x72xf32>, vector<72x16xf32>, vector<8x16xf32> -> vector<8x16xf32>
    %c0_88 = arith.constant 0 : index
    %c96 = arith.constant 96 : index
    %55 = vector.load %arg14[%c0_88, %c96] : memref<8x256xf32, #tpu.memory_space<vmem>>, vector<8x16xf32>
    tpu.vector_store %arg14[%c0_88, %c96], %54 {strides = array<i32>} : memref<8x256xf32, #tpu.memory_space<vmem>>, vector<8x16xf32>,
    %c7 = arith.constant 7 : index
    %c0_89 = arith.constant 0 : index
    %c0_90 = arith.constant 0 : index
    %56 = vector.load %arg13[%c7, %c0_89, %c0_90] : memref<16x72x16xf32, #tpu.memory_space<vmem>>, vector<1x72x16xf32>
    %57 = vector.shape_cast %56 : vector<1x72x16xf32> to vector<72x16xf32>
    %cst_91 = arith.constant dense<0.000000e+00> : vector<8x16xf32>
    %58 = tpu.matmul %27, %57, %cst_91 {dimension_numbers = #tpu.dot_dimension_numbers<[1], [0], [0], [1], [0, 0, 1, 1], [], []>} : vector<8x72xf32>, vector<72x16xf32>, vector<8x16xf32> -> vector<8x16xf32>
    %c0_92 = arith.constant 0 : index
    %c112 = arith.constant 112 : index
    %59 = vector.load %arg14[%c0_92, %c112] : memref<8x256xf32, #tpu.memory_space<vmem>>, vector<8x16xf32>
    tpu.vector_store %arg14[%c0_92, %c112], %58 {strides = array<i32>} : memref<8x256xf32, #tpu.memory_space<vmem>>, vector<8x16xf32>,
    %c8_93 = arith.constant 8 : index
    %c0_94 = arith.constant 0 : index
    %c0_95 = arith.constant 0 : index
    %60 = vector.load %arg13[%c8_93, %c0_94, %c0_95] : memref<16x72x16xf32, #tpu.memory_space<vmem>>, vector<1x72x16xf32>
    %61 = vector.shape_cast %60 : vector<1x72x16xf32> to vector<72x16xf32>
    %cst_96 = arith.constant dense<0.000000e+00> : vector<8x16xf32>
    %62 = tpu.matmul %27, %61, %cst_96 {dimension_numbers = #tpu.dot_dimension_numbers<[1], [0], [0], [1], [0, 0, 1, 1], [], []>} : vector<8x72xf32>, vector<72x16xf32>, vector<8x16xf32> -> vector<8x16xf32>
    %c0_97 = arith.constant 0 : index
    %c128 = arith.constant 128 : index
    %63 = vector.load %arg14[%c0_97, %c128] : memref<8x256xf32, #tpu.memory_space<vmem>>, vector<8x16xf32>
    tpu.vector_store %arg14[%c0_97, %c128], %62 {strides = array<i32>} : memref<8x256xf32, #tpu.memory_space<vmem>>, vector<8x16xf32>,
    %c9 = arith.constant 9 : index
    %c0_98 = arith.constant 0 : index
    %c0_99 = arith.constant 0 : index
    %64 = vector.load %arg13[%c9, %c0_98, %c0_99] : memref<16x72x16xf32, #tpu.memory_space<vmem>>, vector<1x72x16xf32>
    %65 = vector.shape_cast %64 : vector<1x72x16xf32> to vector<72x16xf32>
    %cst_100 = arith.constant dense<0.000000e+00> : vector<8x16xf32>
    %66 = tpu.matmul %27, %65, %cst_100 {dimension_numbers = #tpu.dot_dimension_numbers<[1], [0], [0], [1], [0, 0, 1, 1], [], []>} : vector<8x72xf32>, vector<72x16xf32>, vector<8x16xf32> -> vector<8x16xf32>
    %c0_101 = arith.constant 0 : index
    %c144 = arith.constant 144 : index
    %67 = vector.load %arg14[%c0_101, %c144] : memref<8x256xf32, #tpu.memory_space<vmem>>, vector<8x16xf32>
    tpu.vector_store %arg14[%c0_101, %c144], %66 {strides = array<i32>} : memref<8x256xf32, #tpu.memory_space<vmem>>, vector<8x16xf32>,
    %c10 = arith.constant 10 : index
    %c0_102 = arith.constant 0 : index
    %c0_103 = arith.constant 0 : index
    %68 = vector.load %arg13[%c10, %c0_102, %c0_103] : memref<16x72x16xf32, #tpu.memory_space<vmem>>, vector<1x72x16xf32>
    %69 = vector.shape_cast %68 : vector<1x72x16xf32> to vector<72x16xf32>
    %cst_104 = arith.constant dense<0.000000e+00> : vector<8x16xf32>
    %70 = tpu.matmul %27, %69, %cst_104 {dimension_numbers = #tpu.dot_dimension_numbers<[1], [0], [0], [1], [0, 0, 1, 1], [], []>} : vector<8x72xf32>, vector<72x16xf32>, vector<8x16xf32> -> vector<8x16xf32>
    %c0_105 = arith.constant 0 : index
    %c160 = arith.constant 160 : index
    %71 = vector.load %arg14[%c0_105, %c160] : memref<8x256xf32, #tpu.memory_space<vmem>>, vector<8x16xf32>
    tpu.vector_store %arg14[%c0_105, %c160], %70 {strides = array<i32>} : memref<8x256xf32, #tpu.memory_space<vmem>>, vector<8x16xf32>,
    %c11 = arith.constant 11 : index
    %c0_106 = arith.constant 0 : index
    %c0_107 = arith.constant 0 : index
    %72 = vector.load %arg13[%c11, %c0_106, %c0_107] : memref<16x72x16xf32, #tpu.memory_space<vmem>>, vector<1x72x16xf32>
    %73 = vector.shape_cast %72 : vector<1x72x16xf32> to vector<72x16xf32>
    %cst_108 = arith.constant dense<0.000000e+00> : vector<8x16xf32>
    %74 = tpu.matmul %27, %73, %cst_108 {dimension_numbers = #tpu.dot_dimension_numbers<[1], [0], [0], [1], [0, 0, 1, 1], [], []>} : vector<8x72xf32>, vector<72x16xf32>, vector<8x16xf32> -> vector<8x16xf32>
    %c0_109 = arith.constant 0 : index
    %c176 = arith.constant 176 : index
    %75 = vector.load %arg14[%c0_109, %c176] : memref<8x256xf32, #tpu.memory_space<vmem>>, vector<8x16xf32>
    tpu.vector_store %arg14[%c0_109, %c176], %74 {strides = array<i32>} : memref<8x256xf32, #tpu.memory_space<vmem>>, vector<8x16xf32>,
    %c12 = arith.constant 12 : index
    %c0_110 = arith.constant 0 : index
    %c0_111 = arith.constant 0 : index
    %76 = vector.load %arg13[%c12, %c0_110, %c0_111] : memref<16x72x16xf32, #tpu.memory_space<vmem>>, vector<1x72x16xf32>
    %77 = vector.shape_cast %76 : vector<1x72x16xf32> to vector<72x16xf32>
    %cst_112 = arith.constant dense<0.000000e+00> : vector<8x16xf32>
    %78 = tpu.matmul %27, %77, %cst_112 {dimension_numbers = #tpu.dot_dimension_numbers<[1], [0], [0], [1], [0, 0, 1, 1], [], []>} : vector<8x72xf32>, vector<72x16xf32>, vector<8x16xf32> -> vector<8x16xf32>
    %c0_113 = arith.constant 0 : index
    %c192 = arith.constant 192 : index
    %79 = vector.load %arg14[%c0_113, %c192] : memref<8x256xf32, #tpu.memory_space<vmem>>, vector<8x16xf32>
    tpu.vector_store %arg14[%c0_113, %c192], %78 {strides = array<i32>} : memref<8x256xf32, #tpu.memory_space<vmem>>, vector<8x16xf32>,
    %c13 = arith.constant 13 : index
    %c0_114 = arith.constant 0 : index
    %c0_115 = arith.constant 0 : index
    %80 = vector.load %arg13[%c13, %c0_114, %c0_115] : memref<16x72x16xf32, #tpu.memory_space<vmem>>, vector<1x72x16xf32>
    %81 = vector.shape_cast %80 : vector<1x72x16xf32> to vector<72x16xf32>
    %cst_116 = arith.constant dense<0.000000e+00> : vector<8x16xf32>
    %82 = tpu.matmul %27, %81, %cst_116 {dimension_numbers = #tpu.dot_dimension_numbers<[1], [0], [0], [1], [0, 0, 1, 1], [], []>} : vector<8x72xf32>, vector<72x16xf32>, vector<8x16xf32> -> vector<8x16xf32>
    %c0_117 = arith.constant 0 : index
    %c208 = arith.constant 208 : index
    %83 = vector.load %arg14[%c0_117, %c208] : memref<8x256xf32, #tpu.memory_space<vmem>>, vector<8x16xf32>
    tpu.vector_store %arg14[%c0_117, %c208], %82 {strides = array<i32>} : memref<8x256xf32, #tpu.memory_space<vmem>>, vector<8x16xf32>,
    %c14 = arith.constant 14 : index
    %c0_118 = arith.constant 0 : index
    %c0_119 = arith.constant 0 : index
    %84 = vector.load %arg13[%c14, %c0_118, %c0_119] : memref<16x72x16xf32, #tpu.memory_space<vmem>>, vector<1x72x16xf32>
    %85 = vector.shape_cast %84 : vector<1x72x16xf32> to vector<72x16xf32>
    %cst_120 = arith.constant dense<0.000000e+00> : vector<8x16xf32>
    %86 = tpu.matmul %27, %85, %cst_120 {dimension_numbers = #tpu.dot_dimension_numbers<[1], [0], [0], [1], [0, 0, 1, 1], [], []>} : vector<8x72xf32>, vector<72x16xf32>, vector<8x16xf32> -> vector<8x16xf32>
    %c0_121 = arith.constant 0 : index
    %c224 = arith.constant 224 : index
    %87 = vector.load %arg14[%c0_121, %c224] : memref<8x256xf32, #tpu.memory_space<vmem>>, vector<8x16xf32>
    tpu.vector_store %arg14[%c0_121, %c224], %86 {strides = array<i32>} : memref<8x256xf32, #tpu.memory_space<vmem>>, vector<8x16xf32>,
    %c15 = arith.constant 15 : index
    %c0_122 = arith.constant 0 : index
    %c0_123 = arith.constant 0 : index
    %88 = vector.load %arg13[%c15, %c0_122, %c0_123] : memref<16x72x16xf32, #tpu.memory_space<vmem>>, vector<1x72x16xf32>
    %89 = vector.shape_cast %88 : vector<1x72x16xf32> to vector<72x16xf32>
    %cst_124 = arith.constant dense<0.000000e+00> : vector<8x16xf32>
    %90 = tpu.matmul %27, %89, %cst_124 {dimension_numbers = #tpu.dot_dimension_numbers<[1], [0], [0], [1], [0, 0, 1, 1], [], []>} : vector<8x72xf32>, vector<72x16xf32>, vector<8x16xf32> -> vector<8x16xf32>
    %c0_125 = arith.constant 0 : index
    %c240 = arith.constant 240 : index
    %91 = vector.load %arg14[%c0_125, %c240] : memref<8x256xf32, #tpu.memory_space<vmem>>, vector<8x16xf32>
    tpu.vector_store %arg14[%c0_125, %c240], %90 {strides = array<i32>} : memref<8x256xf32, #tpu.memory_space<vmem>>, vector<8x16xf32>,
    %c0_126 = arith.constant 0 : index
    %c0_127 = arith.constant 0 : index
    %92 = vector.load %arg14[%c0_126, %c0_127] : memref<8x256xf32, #tpu.memory_space<vmem>>, vector<8x256xf32>
    %c0_128 = arith.constant 0 : index
    %c0_129 = arith.constant 0 : index
    %93 = vector.load %arg3[%c0_128, %c0_129] : memref<8x1xf32, #tpu.memory_space<vmem>>, vector<8x1xf32>
    %94 = vector.broadcast %93 : vector<8x1xf32> to vector<8x256xf32>
    %95 = arith.addf %92, %94 : vector<8x256xf32>
    %cst_130 = arith.constant 0.000000e+00 : f32
    %96 = vector.broadcast %cst_130 : f32 to vector<8x256xf32>
    %97 = arith.maximumf %95, %96 : vector<8x256xf32>
    %cst_131 = arith.constant dense<0.000000e+00> : vector<8xf32>
    %98 = vector.multi_reduction <add>, %97, %cst_131 [1] : vector<8x256xf32> to vector<8xf32>
    %99 = vector.shape_cast %98 : vector<8xf32> to vector<8x1xf32>
    %cst_132 = arith.constant 2.560000e+02 : f32
    %100 = vector.broadcast %cst_132 : f32 to vector<8x1xf32>
    %101 = arith.divf %99, %100 : vector<8x1xf32>
    %c0_133 = arith.constant 0 : index
    %c0_134 = arith.constant 0 : index
    %102 = vector.load %arg4[%c0_133, %c0_134] : memref<8x10xf32, #tpu.memory_space<vmem>>, vector<8x10xf32>
    %103 = vector.broadcast %101 : vector<8x1xf32> to vector<8x10xf32>
    %104 = arith.mulf %103, %102 : vector<8x10xf32>
    %cst_135 = arith.constant dense<0.000000e+00> : vector<10xf32>
    %105 = vector.multi_reduction <add>, %104, %cst_135 [0] : vector<8x10xf32> to vector<10xf32>
    %106 = vector.shape_cast %105 : vector<10xf32> to vector<1x10xf32>
    %c0_136 = arith.constant 0 : index
    %c0_137 = arith.constant 0 : index
    %107 = vector.load %arg5[%c0_136, %c0_137] : memref<1x10xf32, #tpu.memory_space<vmem>>, vector<1x10xf32>
    %108 = arith.addf %106, %107 : vector<1x10xf32>
    %c0_138 = arith.constant 0 : index
    %c0_139 = arith.constant 0 : index
    %c0_140 = arith.constant 0 : index
    %109 = vector.load %arg9[%c0_138, %c0_139, %c0_140] : memref<1x1x10xf32, #tpu.memory_space<vmem>>, vector<1x1x10xf32>
    %110 = vector.shape_cast %109 : vector<1x1x10xf32> to vector<1x10xf32>
    %111 = vector.shape_cast %108 : vector<1x10xf32> to vector<1x1x10xf32>
    tpu.vector_store %arg9[%c0_138, %c0_139, %c0_140], %111 {strides = array<i32>} : memref<1x1x10xf32, #tpu.memory_space<vmem>>, vector<1x1x10xf32>,
    %c0_141 = arith.constant 0 : index
    %c0_142 = arith.constant 0 : index
    %112 = vector.load %arg6[%c0_141, %c0_142] : memref<8x256xf32, #tpu.memory_space<vmem>>, vector<8x256xf32>
    %113 = math.exp %112 : vector<8x256xf32>
    %114 = arith.mulf %97, %113 : vector<8x256xf32>
    %c0_143 = arith.constant 0 : index
    %c0_144 = arith.constant 0 : index
    %115 = vector.load %arg7[%c0_143, %c0_144] : memref<8x256xf32, #tpu.memory_space<vmem>>, vector<8x256xf32>
    %116 = arith.addf %114, %115 : vector<8x256xf32>
    %c0_145 = arith.constant 0 : index
    %c0_146 = arith.constant 0 : index
    %c0_147 = arith.constant 0 : index
    %117 = vector.load %arg12[%c0_145, %c0_146, %c0_147] : memref<1x8x256xf32, #tpu.memory_space<vmem>>, vector<1x8x256xf32>
    %118 = vector.shape_cast %117 : vector<1x8x256xf32> to vector<8x256xf32>
    %119 = vector.shape_cast %116 : vector<8x256xf32> to vector<1x8x256xf32>
    tpu.vector_store %arg12[%c0_145, %c0_146, %c0_147], %119 {strides = array<i32>} : memref<1x8x256xf32, #tpu.memory_space<vmem>>, vector<1x8x256xf32>,
    %cst_148 = arith.constant 5.000000e-01 : f32
    %120 = vector.broadcast %cst_148 : f32 to vector<8x256xf32>
    %121 = arith.mulf %120, %116 : vector<8x256xf32>
    %122 = arith.mulf %121, %116 : vector<8x256xf32>
    %cst_149 = arith.constant -0.918938517 : f32
    %123 = vector.broadcast %cst_149 : f32 to vector<8x256xf32>
    %124 = arith.subf %123, %122 : vector<8x256xf32>
    %cst_150 = arith.constant dense<0.000000e+00> : vector<8xf32>
    %125 = vector.multi_reduction <add>, %124, %cst_150 [1] : vector<8x256xf32> to vector<8xf32>
    %126 = vector.shape_cast %125 : vector<8xf32> to vector<8x1xf32>
    %cst_151 = arith.constant dense<0.000000e+00> : vector<1xf32>
    %127 = vector.multi_reduction <add>, %126, %cst_151 [0] : vector<8x1xf32> to vector<1xf32>
    %128 = vector.shape_cast %127 : vector<1xf32> to vector<1x1xf32>
    %c0_152 = arith.constant 0 : index
    %c0_153 = arith.constant 0 : index
    %c0_154 = arith.constant 0 : index
    %129 = vector.load %arg10[%c0_152, %c0_153, %c0_154] : memref<1x1x1xf32, #tpu.memory_space<vmem>>, vector<1x1x1xf32>
    %130 = vector.shape_cast %129 : vector<1x1x1xf32> to vector<1x1xf32>
    %131 = vector.shape_cast %128 : vector<1x1xf32> to vector<1x1x1xf32>
    tpu.vector_store %arg10[%c0_152, %c0_153, %c0_154], %131 {strides = array<i32>} : memref<1x1x1xf32, #tpu.memory_space<vmem>>, vector<1x1x1xf32>,
    %c0_155 = arith.constant 0 : index
    %c0_156 = arith.constant 0 : index
    %132 = vector.load %arg8[%c0_155, %c0_156] : memref<1x1xf32, #tpu.memory_space<vmem>>, vector<1x1xf32>
    %c0_157 = arith.constant 0 : index
    %c0_158 = arith.constant 0 : index
    %c0_159 = arith.constant 0 : index
    %133 = vector.load %arg11[%c0_157, %c0_158, %c0_159] : memref<1x1x1xf32, #tpu.memory_space<vmem>>, vector<1x1x1xf32>
    %134 = vector.shape_cast %133 : vector<1x1x1xf32> to vector<1x1xf32>
    %135 = vector.shape_cast %132 : vector<1x1xf32> to vector<1x1x1xf32>
    tpu.vector_store %arg11[%c0_157, %c0_158, %c0_159], %135 {strides = array<i32>} : memref<1x1x1xf32, #tpu.memory_space<vmem>>, vector<1x1x1xf32>,
    return
  }
  func.func @transform_0(%arg0: i32) -> (i32, i32, i32, i32) {
    %c0_i32 = arith.constant 0 : i32
    %c0_i32_0 = arith.constant 0 : i32
    %c0_i32_1 = arith.constant 0 : i32
    %c0_i32_2 = arith.constant 0 : i32
    return %arg0, %c0_i32, %c0_i32_0, %c0_i32_1 : i32, i32, i32, i32
  }
  func.func @transform_1(%arg0: i32) -> (i32, i32) {
    %c0_i32 = arith.constant 0 : i32
    %c0_i32_0 = arith.constant 0 : i32
    %c0_i32_1 = arith.constant 0 : i32
    return %c0_i32, %c0_i32_0 : i32, i32
  }
  func.func @transform_2(%arg0: i32) -> (i32, i32) {
    %c0_i32 = arith.constant 0 : i32
    %c0_i32_0 = arith.constant 0 : i32
    %c0_i32_1 = arith.constant 0 : i32
    return %c0_i32, %c0_i32_0 : i32, i32
  }
  func.func @transform_3(%arg0: i32) -> (i32, i32) {
    %c0_i32 = arith.constant 0 : i32
    %c0_i32_0 = arith.constant 0 : i32
    %c0_i32_1 = arith.constant 0 : i32
    return %c0_i32, %c0_i32_0 : i32, i32
  }
  func.func @transform_4(%arg0: i32) -> (i32, i32) {
    %c0_i32 = arith.constant 0 : i32
    %c0_i32_0 = arith.constant 0 : i32
    %c0_i32_1 = arith.constant 0 : i32
    return %c0_i32, %c0_i32_0 : i32, i32
  }
  func.func @transform_5(%arg0: i32) -> (i32, i32) {
    %c0_i32 = arith.constant 0 : i32
    %c0_i32_0 = arith.constant 0 : i32
    %c0_i32_1 = arith.constant 0 : i32
    return %c0_i32, %c0_i32_0 : i32, i32
  }
  func.func @transform_6(%arg0: i32) -> (i32, i32) {
    %c0_i32 = arith.constant 0 : i32
    %c0_i32_0 = arith.constant 0 : i32
    %c0_i32_1 = arith.constant 0 : i32
    return %c0_i32, %c0_i32_0 : i32, i32
  }
  func.func @transform_7(%arg0: i32) -> (i32, i32) {
    %c0_i32 = arith.constant 0 : i32
    %c0_i32_0 = arith.constant 0 : i32
    %c0_i32_1 = arith.constant 0 : i32
    return %c0_i32, %c0_i32_0 : i32, i32
  }
  func.func @transform_8(%arg0: i32) -> (i32, i32, i32) {
    %c0_i32 = arith.constant 0 : i32
    %c0_i32_0 = arith.constant 0 : i32
    %c0_i32_1 = arith.constant 0 : i32
    return %arg0, %c0_i32, %c0_i32_0 : i32, i32, i32
  }
  func.func @transform_9(%arg0: i32) -> (i32, i32, i32) {
    %c0_i32 = arith.constant 0 : i32
    %c0_i32_0 = arith.constant 0 : i32
    %c0_i32_1 = arith.constant 0 : i32
    return %arg0, %c0_i32, %c0_i32_0 : i32, i32, i32
  }
  func.func @transform_10(%arg0: i32) -> (i32, i32, i32) {
    %c0_i32 = arith.constant 0 : i32
    %c0_i32_0 = arith.constant 0 : i32
    %c0_i32_1 = arith.constant 0 : i32
    return %arg0, %c0_i32, %c0_i32_0 : i32, i32, i32
  }
  func.func @transform_11(%arg0: i32) -> (i32, i32, i32) {
    %c0_i32 = arith.constant 0 : i32
    %c0_i32_0 = arith.constant 0 : i32
    %c0_i32_1 = arith.constant 0 : i32
    return %arg0, %c0_i32, %c0_i32_0 : i32, i32, i32
  }
}

</mosaic_0001>

<bundles_post_ra>
// kernel: dhm_forward.1
= control target key start
LH: loop header
LB: loop body
LE: loop exit
PB: predicated region body
PF: predicated region fallthrough
CT: control target
= control target key end

     0   :  { %s4250_s0 = inlined_call_operand.vmem [shape: f32[2,18,8,18], index: 0, kind: input, shape index: {}]   ;;  %s4251_s1 = inlined_call_operand.vmem [shape: f32[8,72], index: 1, kind: input, shape index: {}]   ;;  %s4252_s2 = inlined_call_operand.vmem [shape: f32[8,1], index: 2, kind: input, shape index: {}]   ;;  %s4253_s3 = inlined_call_operand.vmem [shape: f32[8,10], index: 3, kind: input, shape index: {}]   ;;  %s4254_s4 = inlined_call_operand.vmem [shape: f32[1,10], index: 4, kind: input, shape index: {}]   ;;  %s4255_s5 = inlined_call_operand.vmem [shape: f32[8,256], index: 5, kind: input, shape index: {}]   ;;  %s4256_s6 = inlined_call_operand.vmem [shape: f32[8,256], index: 6, kind: input, shape index: {}]   ;;  %s4257_s7 = inlined_call_operand.<no memory space> [shape: f32[1,1], index: 7, kind: input, shape index: {}]   ;;  %s4258_s8 = inlined_call_operand.hbm [shape: f32[2,1,10], index: 8, kind: output, shape index: {0}]   ;;  %s4259_s9 = inlined_call_operand.vmem [shape: f32[2,1,1], index: 9, kind: output, shape index: {1}]   ;;  %s4260_s10 = inlined_call_operand.vmem [shape: f32[2,1,1], index: 10, kind: output, shape index: {2}]   ;;  %s4261_s11 = inlined_call_operand.vmem [shape: f32[2,8,256], index: 11, kind: output, shape index: {3}]  }
   0x1   :  { %4262 = sst [smem:[#allocation8_spill]] %s4250_s0  ;;  %v17_v0 = vstv %s4257_s7 }
   0x2   :  { %18 = vst [vmem:[#allocation4] sm:$0x1] %v17_v0 }
   0x3   :  { %19 = vsyncpa [#allocation6], 0 }
   0x4   :  { %21 = vsyncpa [#allocation6 + $0x1], 0  ;;  %s3483_s19 = smov 0   ;;  %s3485_s20 = smov 0  }
   0x5   :  { %s3487_s21 = smov 0   ;;  %s3489_s22 = smov 0  }
   0x6 LB: > { %s3504_s7 = sadd.s32 4294967295, %s3405_s22   ;;  %s2668_s23 = sadd.s32 4294967294, %s3405_s22   ;;  %s3405_s22 = sphi %s3489_s22, %s4270_s22   ;;  %s3401_s21 = sphi %s3487_s21, %s4269_s21   ;;  %s3397_s20 = sphi %s3485_s20, %s4268_s20   ;;  %s3393_s19 = sphi %s3483_s19, %s4267_s19  }
   0x7   : > { %s3508_s24 = sadd.s32 1, %s3405_s22   ;;  %s207_s25 = sadd.s32 1, %s3401_s21 }
   0x8   : > { %s204_s26 = ssub.s32 %s3405_s22, %s3508_s24  ;;  %p217_p0 = scmp.ne.s32.totalorder %s3401_s21, %s3397_s20 }
   0x9   : > { %p205_p1 = scmp.eq.s32.totalorder %s204_s26, 0  ;;  %p218_p2 = scmp.eq.s32.totalorder %s3504_s7, 1 }
   0xa   : > { %p223_p3 = scmp.ne.s32.totalorder %s3397_s20, %s3393_s19  ;;  %p224_p4 = scmp.eq.s32.totalorder %s2668_s23, 1 }
   0xb   : > { %s3519_s27 = scalar_select %p205_p1, %s3401_s21, %s207_s25  }
   0xc   : > { %p3521_p5 = por %p218_p2, %p217_p0  ;;  %p3525_p6 = por %p224_p4, %p223_p3 }
   0xd   : > { %p2671_p7 = scmp.ge.s32.totalorder %s3405_s22, 1  ;;  %p349_p8 = scmp.lt.s32.totalorder %s3405_s22, 3 }
   0xf   : > { %p350_p9 = pnand %p2671_p7, %p349_p8 }
  0x10   : > { %p399_p10 = scmp.lt.s32.totalorder (!%p350_p9), %s3504_s7, 1  ;;  %s4265_s0 = sld [smem:[#allocation8_spill]] (!%p350_p9) }
  0x11   : > { %353 = sbr.rel (%p350_p9) target bundleno = 843 (0x34b), region = 52  ;;  %s3408_s16 = smov (!%p350_p9), 126  }
  0x12   : > { %s3409_s17 = smov (!%p350_p9), 127   ;;  %s3413_s13 = smov (!%p350_p9), 32  }
  0x13   : > { %s3414_s14 = smov (!%p350_p9), 48   ;;  %s3418_s18 = smov (!%p350_p9), 112  }
  0x14   : > { %s2787_s26 = sshll.u32 (!%p350_p9), %s3504_s7, 4 }
  0x16   : > { %v3407_v1 = vmov 0.0   ;;  %s3535_s30 = scalar_select %p399_p10, %s3504_s7, 1  ;;  %vm431_vm0 = vcmask 130048   ;;  %vm3410_vm1 = vmmov 0   ;;  %v3804_v61 = vld [vmem:[%s4251_s1] sm:$0xff]  ;;  %vm1100_vm2 = vcmask 588800  }
  0x17   : > { %2951 = vmatprep.subr.mxu0 %v3407_v1  ;;  %2972 = vmatprep.subr.mxu1 %v3407_v1  ;;  %vm1259_vm3 = vcmask 261248   ;;  %vm1345_vm4 = vcmask 392448   ;;  %vm1431_vm5 = vcmask 523648   ;;  %vm1517_vm6 = vcmask 654848  }
  0x18   : > { %s3287_s12 = smul.u32 144, %s3535_s30  ;;  %2969 = vmatprep.mubr.msk.f32.mxu0 %vm3410_vm1, %v3407_v1  ;;  %2990 = vmatprep.mubr.msk.f32.mxu1 %vm3410_vm1, %v3407_v1  ;;  %vm1603_vm7 = vcmask 786048   ;;  %vm1689_vm8 = vcmask 917248   ;;  %vm1775_vm9 = vcmask 1048448   ;;  %vm2513_vm10 = vcmask 0  }
  0x19   : > { %vm2472_vm11 = vcmask 80896   ;;  %vm2482_vm12 = vcmask 73728  }
  0x1a   : > { %s3541_s15 = scalar_lea.vmem %s4265_s0, %s3287_s12  ;;  %s3412_s12 = smov 16  }
  0x1b   : > { %v2755_v2 = vld [vmem:[%s3541_s15 + $0x10] sm:$0xff]  ;;  %v2756_v3 = vld [vmem:[%s3541_s15 + $0x18] sm:$0xff]  ;;  %v2707_v4 = vld [vmem:[%s3541_s15 + $0x8] sm:$0xff] }
  0x1c   : > { %1026 = vrot.lane.b32.xlu0 %v2755_v2, %s3408_s16  ;;  %930 = vrot.lane.b32.xlu1 %v2755_v2, %s3409_s17  ;;  %v544_v5 = vld [vmem:[%s3541_s15] sm:$0xff]  ;;  %882 = vst.msk [vmem:[#allocation2 + $0x30] sm:$0xff] %vm431_vm0, %v2755_v2  ;;  %883 = vst.msk [vmem:[#allocation2 + $0x78] sm:$0xff] %vm431_vm0, %v2756_v3  ;;  %v2758_v7 = vld [vmem:[%s3541_s15 + $0x28] sm:$0xff] }
  0x1d   : > { %v3550_v6 = vld [vmem:[%s3541_s15 + $0x20] sm:$0xff]  ;;  %657 = vst.msk [vmem:[#allocation2 + $0x18] sm:$0xff] %vm431_vm0, %v2707_v4  ;;  %658 = vst.msk [vmem:[#allocation2 + $0x60] sm:$0xff] %vm431_vm0, %v2755_v2  ;;  %v3562_v8 = vld [vmem:[%s3541_s15 + $0x30] sm:$0xff] }
  0x1e   : > { %433 = vst.msk [vmem:[#allocation2 + $0x48] sm:$0xff] %vm431_vm0, %v2707_v4  ;;  %659 = vst.msk [vmem:[#allocation2 + $0xa8] sm:$0xff] %vm431_vm0, %v2756_v3  ;;  %v3565_v9 = vld [vmem:[%s3541_s15 + $0x38] sm:$0xff]  ;;  %v3575_v10 = vld [vmem:[%s3541_s15 + $0x40] sm:$0xff] }
  0x1f   : > { %434 = vst.msk [vmem:[#allocation2 + $0x90] sm:$0xff] %vm431_vm0, %v2755_v2  ;;  %435 = vst.msk [vmem:[#allocation2 + $0xd8] sm:$0xff] %vm431_vm0, %v2756_v3  ;;  %v3578_v11 = vld [vmem:[%s3541_s15 + $0x48] sm:$0xff]  ;;  %v3581_v12 = vld [vmem:[%s3541_s15 + $0x50] sm:$0xff] }
  0x20   : > { %432 = vst.msk [vmem:[#allocation2] sm:$0xff] %vm431_vm0, %v544_v5  ;;  %884 = vst.msk [vmem:[#allocation2 + $0xc0] sm:$0xff] %vm431_vm0, %v3550_v6  ;;  %1028 = vrot.lane.b32.xlu0 %v2756_v3, %s3408_s16  ;;  %932 = vrot.lane.b32.xlu1 %v2756_v3, %s3409_s17  ;;  %v421_v13 = vld [vmem:[%s3541_s15 + $0x30] sm:$0xff]  ;;  %v422_v14 = vld [vmem:[%s3541_s15 + $0x38] sm:$0xff] }
  0x21   : > { %660 = vst.msk [vmem:[#allocation2 + $0xf0] sm:$0xff] %vm431_vm0, %v3550_v6  ;;  %436 = vst.msk [vmem:[#allocation2 + $0x120] sm:$0xff] %vm431_vm0, %v3550_v6  ;;  %v3681_v15 = vld [vmem:[%s3541_s15 + $0x58] sm:$0xff]  ;;  %v2683_v17 = vld [vmem:[%s3541_s15 + $0x48] sm:$0xff] }
  0x22   : > { %885 = vst.msk [vmem:[#allocation2 + $0x108] sm:$0xff] %vm431_vm0, %v2758_v7  ;;  %886 = vst.msk [vmem:[#allocation2 + $0x150] sm:$0xff] %vm431_vm0, %v3562_v8  ;;  %v2732_v16 = vld [vmem:[%s3541_s15 + $0x58] sm:$0xff]  ;;  %v2684_v18 = vld [vmem:[%s3541_s15 + $0x50] sm:$0xff] }
  0x23   : > { %887 = vst.msk [vmem:[#allocation2 + $0x198] sm:$0xff] %vm431_vm0, %v3565_v9  ;;  %661 = vst.msk [vmem:[#allocation2 + $0x138] sm:$0xff] %vm431_vm0, %v2758_v7  ;;  %v423_v19 = vld [vmem:[%s3541_s15 + $0x40] sm:$0xff]  ;;  %v3729_v24 = vld [vmem:[%s3541_s15 + $0x68] sm:$0xff] }
  0x24   : > { %662 = vst.msk [vmem:[#allocation2 + $0x180] sm:$0xff] %vm431_vm0, %v3562_v8  ;;  %437 = vst.msk [vmem:[#allocation2 + $0x168] sm:$0xff] %vm431_vm0, %v2758_v7  ;;  %801 = vrot.lane.b32.xlu0 %v2707_v4, %s3408_s16  ;;  %803 = vrot.lane.b32.xlu1 %v2755_v2, %s3408_s16  ;;  %v2733_v22 = vld [vmem:[%s3541_s15 + $0x60] sm:$0xff]  ;;  %v2734_v27 = vld [vmem:[%s3541_s15 + $0x68] sm:$0xff] }
  0x25   : > { %663 = vst.msk [vmem:[#allocation2 + $0x1c8] sm:$0xff] %vm431_vm0, %v3565_v9  ;;  %888 = vst.msk [vmem:[#allocation2 + $0x1e0] sm:$0xff] %vm431_vm0, %v3575_v10  ;;  %v3726_v23 = vld [vmem:[%s3541_s15 + $0x60] sm:$0xff]  ;;  %v1097_v32 = vld [vmem:[#allocation2 + $0x30] sm:$0xff] }
  0x26   : > { %889 = vst.msk [vmem:[#allocation2 + $0x228] sm:$0xff] %vm431_vm0, %v3578_v11  ;;  %664 = vst.msk [vmem:[#allocation2 + $0x210] sm:$0xff] %vm431_vm0, %v3575_v10  ;;  %v1182_v37 = vld [vmem:[#allocation2 + $0x78] sm:$0xff]  ;;  %v1179_v47 = vld [vmem:[#allocation2 + $0x60] sm:$0xff] }
  0x27   : > { %890 = vst.msk [vmem:[#allocation2 + $0x270] sm:$0xff] %vm431_vm0, %v3581_v12  ;;  %438 = vst.msk [vmem:[#allocation2 + $0x1b0] sm:$0xff] %vm431_vm0, %v421_v13  ;;  %v1094_v45 = vld [vmem:[#allocation2 + $0x18] sm:$0xff]  ;;  %v2735_v52 = vld [vmem:[%s3541_s15 + $0x70] sm:$0xff] }
  0x28   : > { %705 = vrot.lane.b32.xlu0 %v2707_v4, %s3409_s17  ;;  %707 = vrot.lane.b32.xlu1 %v2755_v2, %s3409_s17  ;;  %439 = vst.msk [vmem:[#allocation2 + $0x1f8] sm:$0xff] %vm431_vm0, %v422_v14  ;;  %891 = vst.msk [vmem:[#allocation2 + $0x2b8] sm:$0xff] %vm431_vm0, %v2732_v16  ;;  %v3787_v53 = vld [vmem:[%s3541_s15 + $0x70] sm:$0xff]  ;;  %v1091_v57 = vld [vmem:[#allocation2] sm:$0xff] }
  0x29   : > { %667 = vst.msk [vmem:[#allocation2 + $0x2e8] sm:$0xff] %vm431_vm0, %v2732_v16  ;;  %443 = vst.msk [vmem:[#allocation2 + $0x318] sm:$0xff] %vm431_vm0, %v2732_v16  ;;  %v3795_v59 = vld [vmem:[%s3541_s15 + $0x78] sm:$0xff] }
  0x2a   : > { %665 = vst.msk [vmem:[#allocation2 + $0x258] sm:$0xff] %vm431_vm0, %v2683_v17  ;;  %441 = vst.msk [vmem:[#allocation2 + $0x288] sm:$0xff] %vm431_vm0, %v2683_v17  ;;  %v2736_v60 = vld [vmem:[%s3541_s15 + $0x78] sm:$0xff]  ;;  %v1265_v17 = vld [vmem:[#allocation2 + $0xa8] sm:$0xff] }
  0x2b   : > { %666 = vst.msk [vmem:[#allocation2 + $0x2a0] sm:$0xff] %vm431_vm0, %v2684_v18  ;;  %442 = vst.msk [vmem:[#allocation2 + $0x2d0] sm:$0xff] %vm431_vm0, %v2684_v18 }
  0x2c   : > { %576 = vrot.lane.b32.xlu0 %v544_v5, %s3408_s16  ;;  %578 = vrot.lane.b32.xlu1 %v2707_v4, %s3408_s16  ;;  %440 = vst.msk [vmem:[#allocation2 + $0x240] sm:$0xff] %vm431_vm0, %v423_v19  ;;  %892 = vst.msk [vmem:[#allocation2 + $0x300] sm:$0xff] %vm431_vm0, %v2733_v22 }
  0x2d   : > { %668 = vst.msk [vmem:[#allocation2 + $0x330] sm:$0xff] %vm431_vm0, %v2733_v22  ;;  %444 = vst.msk [vmem:[#allocation2 + $0x360] sm:$0xff] %vm431_vm0, %v2733_v22  ;;  %v1351_v22 = vld [vmem:[#allocation2 + $0xf0] sm:$0xff] }
  0x2e   : > { %893 = vst.msk [vmem:[#allocation2 + $0x348] sm:$0xff] %vm431_vm0, %v2734_v27  ;;  %669 = vst.msk [vmem:[#allocation2 + $0x378] sm:$0xff] %vm431_vm0, %v2734_v27 }
  0x2f   : > { %445 = vst.msk [vmem:[#allocation2 + $0x3a8] sm:$0xff] %vm431_vm0, %v2734_v27  ;;  %894 = vst.msk [vmem:[#allocation2 + $0x390] sm:$0xff] %vm431_vm0, %v2735_v52  ;;  %v3862_v27 = vld [vmem:[%s3541_s15 + $0x80] sm:$0xff] }
  0x30   : > { %480 = vrot.lane.b32.xlu0 %v544_v5, %s3409_s17  ;;  %482 = vrot.lane.b32.xlu1 %v2707_v4, %s3409_s17  ;;  %670 = vst.msk [vmem:[#allocation2 + $0x3c0] sm:$0xff] %vm431_vm0, %v2735_v52  ;;  %446 = vst.msk [vmem:[#allocation2 + $0x3f0] sm:$0xff] %vm431_vm0, %v2735_v52 }
  0x31   : > { %895 = vst.msk [vmem:[#allocation2 + $0x3d8] sm:$0xff] %vm431_vm0, %v2736_v60  ;;  %671 = vst.msk [vmem:[#allocation2 + $0x408] sm:$0xff] %vm431_vm0, %v2736_v60 }
  0x32   : > { %447 = vst.msk [vmem:[#allocation2 + $0x438] sm:$0xff] %vm431_vm0, %v2736_v60 }
  0x34   : > { %1030 = vrot.lane.b32.xlu0 %v3550_v6, %s3408_s16  ;;  %1032 = vrot.lane.b32.xlu1 %v2758_v7, %s3408_s16 }
  0x38   : > { %934 = vrot.lane.b32.xlu0 %v3550_v6, %s3409_s17  ;;  %936 = vrot.lane.b32.xlu1 %v2758_v7, %s3409_s17 }
  0x3c   : > { %805 = vrot.lane.b32.xlu0 %v2756_v3, %s3408_s16  ;;  %807 = vrot.lane.b32.xlu1 %v3550_v6, %s3408_s16 }
  0x40   : > { %709 = vrot.lane.b32.xlu0 %v2756_v3, %s3409_s17  ;;  %711 = vrot.lane.b32.xlu1 %v3550_v6, %s3409_s17 }
  0x44   : > { %580 = vrot.lane.b32.xlu0 %v2755_v2, %s3408_s16  ;;  %582 = vrot.lane.b32.xlu1 %v2756_v3, %s3408_s16 }
  0x48   : > { %484 = vrot.lane.b32.xlu0 %v2755_v2, %s3409_s17  ;;  %486 = vrot.lane.b32.xlu1 %v2756_v3, %s3409_s17  ;;  %v1176_v2 = vld [vmem:[#allocation2 + $0x48] sm:$0xff] }
  0x4c   : > { %1034 = vrot.lane.b32.xlu0 %v3562_v8, %s3408_s16  ;;  %1036 = vrot.lane.b32.xlu1 %v3565_v9, %s3408_s16 }
  0x50   : > { %938 = vrot.lane.b32.xlu0 %v3562_v8, %s3409_s17  ;;  %940 = vrot.lane.b32.xlu1 %v3565_v9, %s3409_s17 }
  0x54   : > { %809 = vrot.lane.b32.xlu0 %v2758_v7, %s3408_s16  ;;  %811 = vrot.lane.b32.xlu1 %v3562_v8, %s3408_s16 }
  0x58   : > { %713 = vrot.lane.b32.xlu0 %v2758_v7, %s3409_s17  ;;  %715 = vrot.lane.b32.xlu1 %v3562_v8, %s3409_s17 }
  0x5c   : > { %584 = vrot.lane.b32.xlu0 %v3550_v6, %s3408_s16  ;;  %586 = vrot.lane.b32.xlu1 %v2758_v7, %s3408_s16 }
  0x60   : > { %488 = vrot.lane.b32.xlu0 %v3550_v6, %s3409_s17  ;;  %490 = vrot.lane.b32.xlu1 %v2758_v7, %s3409_s17  ;;  %v1268_v7 = vld [vmem:[#allocation2 + $0xc0] sm:$0xff] }
  0x64   : > { %1038 = vrot.lane.b32.xlu0 %v3575_v10, %s3408_s16  ;;  %1040 = vrot.lane.b32.xlu1 %v3578_v11, %s3408_s16 }
  0x68   : > { %942 = vrot.lane.b32.xlu0 %v3575_v10, %s3409_s17  ;;  %944 = vrot.lane.b32.xlu1 %v3578_v11, %s3409_s17 }
  0x6c   : > { %813 = vrot.lane.b32.xlu0 %v3565_v9, %s3408_s16  ;;  %815 = vrot.lane.b32.xlu1 %v3575_v10, %s3408_s16 }
  0x70   : > { %717 = vrot.lane.b32.xlu0 %v3565_v9, %s3409_s17  ;;  %719 = vrot.lane.b32.xlu1 %v3575_v10, %s3409_s17 }
  0x74   : > { %588 = vrot.lane.b32.xlu0 %v3562_v8, %s3408_s16  ;;  %590 = vrot.lane.b32.xlu1 %v3565_v9, %s3408_s16 }
  0x78   : > { %492 = vrot.lane.b32.xlu0 %v3562_v8, %s3409_s17  ;;  %494 = vrot.lane.b32.xlu1 %v3565_v9, %s3409_s17 }
  0x7c   : > { %1042 = vrot.lane.b32.xlu0 %v3581_v12, %s3408_s16  ;;  %1044 = vrot.lane.b32.xlu1 %v3681_v15, %s3408_s16 }
  0x80   : > { %946 = vrot.lane.b32.xlu0 %v3581_v12, %s3409_s17  ;;  %948 = vrot.lane.b32.xlu1 %v3681_v15, %s3409_s17 }
  0x84   : > { %817 = vrot.lane.b32.xlu0 %v3578_v11, %s3408_s16  ;;  %819 = vrot.lane.b32.xlu1 %v3581_v12, %s3408_s16 }
  0x88   : > { %721 = vrot.lane.b32.xlu0 %v3578_v11, %s3409_s17  ;;  %723 = vrot.lane.b32.xlu1 %v3581_v12, %s3409_s17 }
  0x8c   : > { %592 = vrot.lane.b32.xlu0 %v3575_v10, %s3408_s16  ;;  %594 = vrot.lane.b32.xlu1 %v3578_v11, %s3408_s16 }
  0x8e   : > { %v1027_v20 = vpop.permute.xlu0 %1026  ;;  %v931_v21 = vpop.permute.xlu1 %930 }
  0x8f   : > { %1074 = vst.msk [vmem:[#allocation2 + $0x40] sm:$0xff] %vm431_vm0, %v1027_v20  ;;  %978 = vst.msk [vmem:[#allocation2 + $0x38] sm:$0xff] %vm431_vm0, %v931_v21 }
  0x90   : > { %496 = vrot.lane.b32.xlu0 %v3575_v10, %s3409_s17  ;;  %498 = vrot.lane.b32.xlu1 %v3578_v11, %s3409_s17 }
  0x92   : > { %v1029_v25 = vpop.permute.xlu0 %1028  ;;  %v933_v26 = vpop.permute.xlu1 %932 }
  0x93   : > { %1075 = vst.msk [vmem:[#allocation2 + $0x88] sm:$0xff] %vm431_vm0, %v1029_v25  ;;  %979 = vst.msk [vmem:[#allocation2 + $0x80] sm:$0xff] %vm431_vm0, %v933_v26  ;;  %v2737_v25 = vld [vmem:[%s3541_s15 + $0x80] sm:$0xff] }
  0x94   : > { %1046 = vrot.lane.b32.xlu0 %v3726_v23, %s3408_s16  ;;  %1048 = vrot.lane.b32.xlu1 %v3729_v24, %s3408_s16  ;;  %896 = vst.msk [vmem:[#allocation2 + $0x420] sm:$0xff] %vm431_vm0, %v2737_v25  ;;  %672 = vst.msk [vmem:[#allocation2 + $0x450] sm:$0xff] %vm431_vm0, %v2737_v25 }
  0x96   : > { %v802_v28 = vpop.permute.xlu0 %801  ;;  %v1099_v29 = vld [vmem:[#allocation2 + $0x40] sm:$0xff]  ;;  %v804_v30 = vpop.permute.xlu1 %803  ;;  %v1098_v31 = vld [vmem:[#allocation2 + $0x38] sm:$0xff] }
  0x97   : > { %849 = vst.msk [vmem:[#allocation2 + $0x28] sm:$0xff] %vm431_vm0, %v802_v28  ;;  %2952 = vmatpush3.msra.mxu0 %v1099_v29  ;;  %850 = vst.msk [vmem:[#allocation2 + $0x70] sm:$0xff] %vm431_vm0, %v804_v30  ;;  %v1262_v30 = vld [vmem:[#allocation2 + $0x90] sm:$0xff] }
  0x98   : > { %950 = vrot.lane.b32.xlu0 %v3726_v23, %s3409_s17  ;;  %2953 = vmatprep.subr.mxu0 %v3407_v1 }
  0x99   : > { %952 = vrot.lane.b32.xlu1 %v3729_v24, %s3409_s17  ;;  %2954 = vmatpush3.msra.mxu0 %v1098_v31  ;;  %v2770_v31 = vld [vmem:[%s3541_s15 + $0x88] sm:$0xff] }
  0x9a   : > { %v706_v33 = vpop.permute.xlu0 %705  ;;  %v1184_v34 = vld [vmem:[#allocation2 + $0x88] sm:$0xff]  ;;  %2955 = vmatprep.subr.mxu0 %v3407_v1  ;;  %v708_v35 = vpop.permute.xlu1 %707  ;;  %v1183_v36 = vld [vmem:[#allocation2 + $0x80] sm:$0xff] }
  0x9b   : > { %753 = vst.msk [vmem:[#allocation2 + $0x20] sm:$0xff] %vm431_vm0, %v706_v33  ;;  %2973 = vmatpush3.msra.mxu1 %v1184_v34  ;;  %754 = vst.msk [vmem:[#allocation2 + $0x68] sm:$0xff] %vm431_vm0, %v708_v35  ;;  %2956 = vmatpush3.msra.mxu0 %v1097_v32  ;;  %v2738_v32 = vld [vmem:[%s3541_s15 + $0x88] sm:$0xff]  ;;  %s3415_s15 = smov 64  }
  0x9c   : > { %821 = vrot.lane.b32.xlu0 %v3681_v15, %s3408_s16  ;;  %2957 = vmatprep.subr.mxu0 %v3407_v1  ;;  %897 = vst.msk [vmem:[#allocation2 + $0x468] sm:$0xff] %vm431_vm0, %v2738_v32  ;;  %v1692_v32 = vld [vmem:[#allocation2 + $0x1f8] sm:$0xff] }
  0x9d   : > { %2974 = vmatprep.subr.mxu1 %v3407_v1  ;;  %823 = vrot.lane.b32.xlu1 %v3726_v23, %s3408_s16 }
  0x9e   : > { %v577_v38 = vpop.permute.xlu0 %576  ;;  %v1096_v39 = vld [vmem:[#allocation2 + $0x28] sm:$0xff]  ;;  %2975 = vmatpush3.msra.mxu1 %v1183_v36  ;;  %v579_v40 = vpop.permute.xlu1 %578  ;;  %v1181_v41 = vld [vmem:[#allocation2 + $0x70] sm:$0xff]  ;;  %v1348_v36 = vld [vmem:[#allocation2 + $0xd8] sm:$0xff] }
  0x9f   : > { %624 = vst.msk [vmem:[#allocation2 + $0x10] sm:$0xff] %vm431_vm0, %v577_v38  ;;  %2958 = vmatpush3.msra.mxu0 %v1096_v39  ;;  %2976 = vmatprep.subr.mxu1 %v3407_v1  ;;  %625 = vst.msk [vmem:[#allocation2 + $0x58] sm:$0xff] %vm431_vm0, %v579_v40 }
  0xa0   : > { %725 = vrot.lane.b32.xlu0 %v3681_v15, %s3409_s17  ;;  %2977 = vmatpush3.msra.mxu1 %v1182_v37 }
  0xa1   : > { %2959 = vmatprep.subr.mxu0 %v3407_v1  ;;  %2978 = vmatprep.subr.mxu1 %v3407_v1 }
  0xa2   : > { %727 = vrot.lane.b32.xlu1 %v3726_v23, %s3409_s17  ;;  %v481_v42 = vpop.permute.xlu0 %480  ;;  %v1095_v43 = vld [vmem:[#allocation2 + $0x20] sm:$0xff]  ;;  %2979 = vmatpush3.msra.mxu1 %v1181_v41  ;;  %v483_v44 = vpop.permute.xlu1 %482  ;;  %v1180_v46 = vld [vmem:[#allocation2 + $0x68] sm:$0xff]  ;;  %v1440_v41 = vld [vmem:[#allocation2 + $0x150] sm:$0xff] }
  0xa3   : > { %528 = vst.msk [vmem:[#allocation2 + $0x8] sm:$0xff] %vm431_vm0, %v481_v42  ;;  %2960 = vmatpush3.msra.mxu0 %v1095_v43  ;;  %529 = vst.msk [vmem:[#allocation2 + $0x50] sm:$0xff] %vm431_vm0, %v483_v44  ;;  %2980 = vmatprep.subr.mxu1 %v3407_v1 }
  0xa4   : > { %2961 = vmatprep.subr.mxu0 %v3407_v1  ;;  %596 = vrot.lane.b32.xlu0 %v3581_v12, %s3408_s16 }
  0xa5   : > { %2962 = vmatpush3.msra.mxu0 %v1094_v45  ;;  %2981 = vmatpush3.msra.mxu1 %v1180_v46  ;;  %v1526_v46 = vld [vmem:[#allocation2 + $0x198] sm:$0xff] }
  0xa6   : > { %2963 = vmatprep.subr.mxu0 %v3407_v1  ;;  %598 = vrot.lane.b32.xlu1 %v3681_v15, %s3408_s16  ;;  %v1031_v48 = vpop.permute.xlu0 %1030  ;;  %v1093_v49 = vld [vmem:[#allocation2 + $0x10] sm:$0xff]  ;;  %v1033_v50 = vpop.permute.xlu1 %1032  ;;  %v1178_v51 = vld [vmem:[#allocation2 + $0x58] sm:$0xff] }
  0xa7   : > { %1076 = vst.msk [vmem:[#allocation2 + $0xd0] sm:$0xff] %vm431_vm0, %v1031_v48  ;;  %2964 = vmatpush3.msra.mxu0 %v1093_v49  ;;  %2982 = vmatprep.subr.mxu1 %v3407_v1  ;;  %1077 = vst.msk [vmem:[#allocation2 + $0x118] sm:$0xff] %vm431_vm0, %v1033_v50 }
  0xa8   : > { %500 = vrot.lane.b32.xlu0 %v3581_v12, %s3409_s17  ;;  %2983 = vmatpush3.msra.mxu1 %v1179_v47  ;;  %v1354_v12 = vld [vmem:[#allocation2 + $0x108] sm:$0xff] }
  0xa9   : > { %2965 = vmatprep.subr.mxu0 %v3407_v1  ;;  %2984 = vmatprep.subr.mxu1 %v3407_v1 }
  0xaa   : > { %502 = vrot.lane.b32.xlu1 %v3681_v15, %s3409_s17  ;;  %v935_v54 = vpop.permute.xlu0 %934  ;;  %v1092_v55 = vld [vmem:[#allocation2 + $0x8] sm:$0xff]  ;;  %2985 = vmatpush3.msra.mxu1 %v1178_v51  ;;  %v937_v56 = vpop.permute.xlu1 %936  ;;  %v1177_v58 = vld [vmem:[#allocation2 + $0x50] sm:$0xff]  ;;  %v1437_v51 = vld [vmem:[#allocation2 + $0x138] sm:$0xff] }
  0xab   : > { %980 = vst.msk [vmem:[#allocation2 + $0xc8] sm:$0xff] %vm431_vm0, %v935_v54  ;;  %2966 = vmatpush3.msra.mxu0 %v1092_v55  ;;  %981 = vst.msk [vmem:[#allocation2 + $0x110] sm:$0xff] %vm431_vm0, %v937_v56  ;;  %2986 = vmatprep.subr.mxu1 %v3407_v1 }
  0xac   : > { %1050 = vrot.lane.b32.xlu0 %v3787_v53, %s3408_s16  ;;  %2967 = vmatprep.subr.mxu0 %v3407_v1 }
  0xad   : > { %2968 = vmatpush3.msra.mxu0 %v1091_v57  ;;  %2987 = vmatpush3.msra.mxu1 %v1177_v58  ;;  %v1523_v57 = vld [vmem:[#allocation2 + $0x180] sm:$0xff] }
  0xae   : > { %1052 = vrot.lane.b32.xlu1 %v3795_v59, %s3408_s16  ;;  %v806_v62 = vpop.permute.xlu0 %805  ;;  %2993 = vmatprep.subr.mxu0 %v3407_v1  ;;  %v1270_v63 = vld [vmem:[#allocation2 + $0xd0] sm:$0xff]  ;;  %v808_v0 = vpop.permute.xlu1 %807  ;;  %v1356_v3 = vld [vmem:[#allocation2 + $0x118] sm:$0xff] }
  0xaf   : > { %851 = vst.msk [vmem:[#allocation2 + $0xb8] sm:$0xff] %vm431_vm0, %v806_v62  ;;  %2970 = vmatmul.mubr.msk.f32.vlgmr.msra.gmra.mxu0 %vm1100_vm2, %v3804_v61  ;;  %2988 = vmatprep.subr.mxu1 %v3407_v1  ;;  %852 = vst.msk [vmem:[#allocation2 + $0x100] sm:$0xff] %vm431_vm0, %v808_v0  ;;  %v1434_v0 = vld [vmem:[#allocation2 + $0x120] sm:$0xff] }
  0xb0   : > { %2994 = vmatpush3.msra.mxu0 %v1270_v63  ;;  %954 = vrot.lane.b32.xlu0 %v3787_v53, %s3409_s17 }
  0xb1   : > { %2989 = vmatpush3.msra.mxu1 %v1176_v2  ;;  %2995 = vmatprep.subr.mxu0 %v3407_v1 }
  0xb2   : > { %956 = vrot.lane.b32.xlu1 %v3795_v59, %s3409_s17  ;;  %v710_v4 = vpop.permute.xlu0 %709  ;;  %3014 = vmatprep.subr.mxu1 %v3407_v1  ;;  %v1269_v5 = vld [vmem:[#allocation2 + $0xc8] sm:$0xff]  ;;  %v712_v6 = vpop.permute.xlu1 %711  ;;  %v1355_v8 = vld [vmem:[#allocation2 + $0x110] sm:$0xff] }
  0xb3   : > { %755 = vst.msk [vmem:[#allocation2 + $0xb0] sm:$0xff] %vm431_vm0, %v710_v4  ;;  %2991 = vmatmul.mubr.msk.f32.vlgmr.msra.gmra.mxu1 %vm1100_vm2, %v3804_v61  ;;  %2996 = vmatpush3.msra.mxu0 %v1269_v5  ;;  %756 = vst.msk [vmem:[#allocation2 + $0xf8] sm:$0xff] %vm431_vm0, %v712_v6  ;;  %v1520_v4 = vld [vmem:[#allocation2 + $0x168] sm:$0xff] }
  0xb4   : > { %3015 = vmatpush3.msra.mxu1 %v1356_v3  ;;  %825 = vrot.lane.b32.xlu0 %v3729_v24, %s3408_s16 }
  0xb5   : > { %2997 = vmatprep.subr.mxu0 %v3407_v1  ;;  %3016 = vmatprep.subr.mxu1 %v3407_v1 }
  0xb6   : > { %2998 = vmatpush3.msra.mxu0 %v1268_v7  ;;  %827 = vrot.lane.b32.xlu1 %v3787_v53, %s3408_s16  ;;  %v581_v9 = vpop.permute.xlu0 %580  ;;  %v1267_v10 = vld [vmem:[#allocation2 + $0xb8] sm:$0xff]  ;;  %v583_v11 = vpop.permute.xlu1 %582  ;;  %v1353_v13 = vld [vmem:[#allocation2 + $0x100] sm:$0xff] }
  0xb7   : > { %626 = vst.msk [vmem:[#allocation2 + $0xa0] sm:$0xff] %vm431_vm0, %v581_v9  ;;  %2999 = vmatprep.subr.mxu0 %v3407_v1  ;;  %3017 = vmatpush3.msra.mxu1 %v1355_v8  ;;  %627 = vst.msk [vmem:[#allocation2 + $0xe8] sm:$0xff] %vm431_vm0, %v583_v11  ;;  %v1612_v9 = vld [vmem:[#allocation2 + $0x1e0] sm:$0xff] }
  0xb8   : > { %3000 = vmatpush3.msra.mxu0 %v1267_v10  ;;  %729 = vrot.lane.b32.xlu0 %v3729_v24, %s3409_s17 }
  0xb9   : > { %3018 = vmatprep.subr.mxu1 %v3407_v1  ;;  %3001 = vmatprep.subr.mxu0 %v3407_v1 }
  0xba   : > { %3019 = vmatpush3.msra.mxu1 %v1354_v12  ;;  %731 = vrot.lane.b32.xlu1 %v3787_v53, %s3409_s17  ;;  %v485_v14 = vpop.permute.xlu0 %484  ;;  %v1266_v15 = vld [vmem:[#allocation2 + $0xb0] sm:$0xff]  ;;  %v487_v16 = vpop.permute.xlu1 %486  ;;  %v1352_v18 = vld [vmem:[#allocation2 + $0xf8] sm:$0xff] }
  0xbb   : > { %530 = vst.msk [vmem:[#allocation2 + $0x98] sm:$0xff] %vm431_vm0, %v485_v14  ;;  %3020 = vmatprep.subr.mxu1 %v3407_v1  ;;  %3002 = vmatpush3.msra.mxu0 %v1266_v15  ;;  %531 = vst.msk [vmem:[#allocation2 + $0xe0] sm:$0xff] %vm431_vm0, %v487_v16  ;;  %v1698_v14 = vld [vmem:[#allocation2 + $0x228] sm:$0xff] }
  0xbc   : > { %3021 = vmatpush3.msra.mxu1 %v1353_v13  ;;  %600 = vrot.lane.b32.xlu0 %v3726_v23, %s3408_s16 }
  0xbd   : > { %3003 = vmatprep.subr.mxu0 %v3407_v1  ;;  %3022 = vmatprep.subr.mxu1 %v3407_v1 }
  0xbe   : > { %3004 = vmatpush3.msra.mxu0 %v1265_v17  ;;  %602 = vrot.lane.b32.xlu1 %v3729_v24, %s3408_s16  ;;  %v1035_v19 = vpop.permute.xlu0 %1034  ;;  %v1264_v20 = vld [vmem:[#allocation2 + $0xa0] sm:$0xff]  ;;  %v1037_v21 = vpop.permute.xlu1 %1036  ;;  %v1350_v26 = vld [vmem:[#allocation2 + $0xe8] sm:$0xff] }
  0xbf   : > { %1078 = vst.msk [vmem:[#allocation2 + $0x160] sm:$0xff] %vm431_vm0, %v1035_v19  ;;  %3005 = vmatprep.subr.mxu0 %v3407_v1  ;;  %3023 = vmatpush3.msra.mxu1 %v1352_v18  ;;  %1079 = vst.msk [vmem:[#allocation2 + $0x1a8] sm:$0xff] %vm431_vm0, %v1037_v21  ;;  %v1609_v19 = vld [vmem:[#allocation2 + $0x1c8] sm:$0xff]  ;;  %v1695_v21 = vld [vmem:[#allocation2 + $0x210] sm:$0xff] }
  0xc0   : > { %3006 = vmatpush3.msra.mxu0 %v1264_v20  ;;  %504 = vrot.lane.b32.xlu0 %v3726_v23, %s3409_s17 }
  0xc1   : > { %3024 = vmatprep.subr.mxu1 %v3407_v1  ;;  %3007 = vmatprep.subr.mxu0 %v3407_v1 }
  0xc2   : > { %3025 = vmatpush3.msra.mxu1 %v1351_v22  ;;  %506 = vrot.lane.b32.xlu1 %v3729_v24, %s3409_s17  ;;  %v939_v28 = vpop.permute.xlu0 %938  ;;  %v1263_v29 = vld [vmem:[#allocation2 + $0x98] sm:$0xff]  ;;  %v941_v23 = vpop.permute.xlu1 %940  ;;  %v1349_v24 = vld [vmem:[#allocation2 + $0xe0] sm:$0xff] }
  0xc3   : > { %982 = vst.msk [vmem:[#allocation2 + $0x158] sm:$0xff] %vm431_vm0, %v939_v28  ;;  %3026 = vmatprep.subr.mxu1 %v3407_v1  ;;  %3008 = vmatpush3.msra.mxu0 %v1263_v29  ;;  %983 = vst.msk [vmem:[#allocation2 + $0x1a0] sm:$0xff] %vm431_vm0, %v941_v23 }
  0xc4   : > { %3027 = vmatpush3.msra.mxu1 %v1350_v26  ;;  %1054 = vrot.lane.b32.xlu0 %v3862_v27, %s3408_s16 }
  0xc5   : > { %3009 = vmatprep.subr.mxu0 %v3407_v1  ;;  %3011 = vmatprep.mubr.msk.f32.mxu0 %vm3410_vm1, %v3407_v1 }
  0xc6   : > { %3010 = vmatpush3.msra.mxu0 %v1262_v30  ;;  %1056 = vrot.lane.b32.xlu1 %v2770_v31, %s3408_s16  ;;  %v810_v33 = vpop.permute.xlu0 %809  ;;  %v1442_v34 = vld [vmem:[#allocation2 + $0x160] sm:$0xff]  ;;  %v812_v35 = vpop.permute.xlu1 %811  ;;  %v1528_v40 = vld [vmem:[#allocation2 + $0x1a8] sm:$0xff]  ;;  %v1606_v30 = vld [vmem:[#allocation2 + $0x1b0] sm:$0xff] }
  0xc7   : > { %853 = vst.msk [vmem:[#allocation2 + $0x148] sm:$0xff] %vm431_vm0, %v810_v33  ;;  %3028 = vmatprep.subr.mxu1 %v3407_v1  ;;  %3035 = vmatprep.subr.mxu0 %v3407_v1  ;;  %854 = vst.msk [vmem:[#allocation2 + $0x190] sm:$0xff] %vm431_vm0, %v812_v35 }
  0xc8   : > { %3012 = vmatmul.mubr.msk.f32.vlgmr.msra.gmra.mxu0 %vm1100_vm2, %v3804_v61  ;;  %3029 = vmatpush3.msra.mxu1 %v1349_v24 }
  0xc9   : > { %3036 = vmatpush3.msra.mxu0 %v1442_v34  ;;  %958 = vrot.lane.b32.xlu0 %v3862_v27, %s3409_s17 }
  0xca   : > { %3030 = vmatprep.subr.mxu1 %v3407_v1  ;;  %960 = vrot.lane.b32.xlu1 %v2770_v31, %s3409_s17  ;;  %v714_v37 = vpop.permute.xlu0 %713  ;;  %v1441_v38 = vld [vmem:[#allocation2 + $0x158] sm:$0xff]  ;;  %v716_v39 = vpop.permute.xlu1 %715  ;;  %v1527_v43 = vld [vmem:[#allocation2 + $0x1a0] sm:$0xff] }
  0xcb   : > { %3031 = vmatpush3.msra.mxu1 %v1348_v36  ;;  %757 = vst.msk [vmem:[#allocation2 + $0x140] sm:$0xff] %vm431_vm0, %v714_v37  ;;  %3032 = vmatprep.mubr.msk.f32.mxu1 %vm3410_vm1, %v3407_v1  ;;  %758 = vst.msk [vmem:[#allocation2 + $0x188] sm:$0xff] %vm431_vm0, %v716_v39  ;;  %v1784_v39 = vld [vmem:[#allocation2 + $0x270] sm:$0xff] }
  0xcc   : > { %3037 = vmatprep.subr.mxu0 %v3407_v1  ;;  %3056 = vmatprep.subr.mxu1 %v3407_v1 }
  0xcd   : > { %3033 = vmatmul.mubr.msk.f32.vlgmr.msra.gmra.mxu1 %vm1100_vm2, %v3804_v61  ;;  %3038 = vmatpush3.msra.mxu0 %v1441_v38 }
  0xce   : > { %3057 = vmatpush3.msra.mxu1 %v1528_v40  ;;  %829 = vrot.lane.b32.xlu0 %v3795_v59, %s3408_s16  ;;  %v585_v42 = vpop.permute.xlu0 %584  ;;  %v587_v44 = vpop.permute.xlu1 %586  ;;  %v1439_v45 = vld [vmem:[#allocation2 + $0x148] sm:$0xff]  ;;  %v1525_v50 = vld [vmem:[#allocation2 + $0x190] sm:$0xff] }
  0xcf   : > { %3039 = vmatprep.subr.mxu0 %v3407_v1  ;;  %831 = vrot.lane.b32.xlu1 %v3862_v27, %s3408_s16  ;;  %628 = vst.msk [vmem:[#allocation2 + $0x130] sm:$0xff] %vm431_vm0, %v585_v42  ;;  %629 = vst.msk [vmem:[#allocation2 + $0x178] sm:$0xff] %vm431_vm0, %v587_v44 }
  0xd0   : > { %3040 = vmatpush3.msra.mxu0 %v1440_v41  ;;  %3058 = vmatprep.subr.mxu1 %v3407_v1  ;;  %v1865_v41 = vld [vmem:[#allocation2 + $0x2b8] sm:$0xff] }
  0xd1   : > { %3041 = vmatprep.subr.mxu0 %v3407_v1  ;;  %3059 = vmatpush3.msra.mxu1 %v1527_v43 }
  0xd2   : > { %3042 = vmatpush3.msra.mxu0 %v1439_v45  ;;  %733 = vrot.lane.b32.xlu0 %v3795_v59, %s3409_s17  ;;  %v489_v47 = vpop.permute.xlu0 %488  ;;  %v1438_v48 = vld [vmem:[#allocation2 + $0x140] sm:$0xff]  ;;  %v491_v49 = vpop.permute.xlu1 %490  ;;  %v1524_v54 = vld [vmem:[#allocation2 + $0x188] sm:$0xff] }
  0xd3   : > { %3060 = vmatprep.subr.mxu1 %v3407_v1  ;;  %735 = vrot.lane.b32.xlu1 %v3862_v27, %s3409_s17  ;;  %532 = vst.msk [vmem:[#allocation2 + $0x128] sm:$0xff] %vm431_vm0, %v489_v47  ;;  %533 = vst.msk [vmem:[#allocation2 + $0x170] sm:$0xff] %vm431_vm0, %v491_v49 }
  0xd4   : > { %3061 = vmatpush3.msra.mxu1 %v1526_v46  ;;  %3043 = vmatprep.subr.mxu0 %v3407_v1  ;;  %v1781_v46 = vld [vmem:[#allocation2 + $0x258] sm:$0xff] }
  0xd5   : > { %3062 = vmatprep.subr.mxu1 %v3407_v1  ;;  %3044 = vmatpush3.msra.mxu0 %v1438_v48 }
  0xd6   : > { %3063 = vmatpush3.msra.mxu1 %v1525_v50  ;;  %604 = vrot.lane.b32.xlu0 %v3787_v53, %s3408_s16  ;;  %v1039_v52 = vpop.permute.xlu0 %1038  ;;  %v1041_v55 = vpop.permute.xlu1 %1040  ;;  %v1436_v56 = vld [vmem:[#allocation2 + $0x130] sm:$0xff]  ;;  %v1522_v63 = vld [vmem:[#allocation2 + $0x178] sm:$0xff] }
  0xd7   : > { %3045 = vmatprep.subr.mxu0 %v3407_v1  ;;  %606 = vrot.lane.b32.xlu1 %v3795_v59, %s3408_s16  ;;  %1080 = vst.msk [vmem:[#allocation2 + $0x1f0] sm:$0xff] %vm431_vm0, %v1039_v52  ;;  %1081 = vst.msk [vmem:[#allocation2 + $0x238] sm:$0xff] %vm431_vm0, %v1041_v55  ;;  %s3416_s16 = smov 80  }
  0xd8   : > { %3046 = vmatpush3.msra.mxu0 %v1437_v51  ;;  %3064 = vmatprep.subr.mxu1 %v3407_v1  ;;  %v1862_v51 = vld [vmem:[#allocation2 + $0x2a0] sm:$0xff] }
  0xd9   : > { %3047 = vmatprep.subr.mxu0 %v3407_v1  ;;  %3065 = vmatpush3.msra.mxu1 %v1524_v54 }
  0xda   : > { %3048 = vmatpush3.msra.mxu0 %v1436_v56  ;;  %508 = vrot.lane.b32.xlu0 %v3787_v53, %s3409_s17  ;;  %v943_v58 = vpop.permute.xlu0 %942  ;;  %v1435_v60 = vld [vmem:[#allocation2 + $0x128] sm:$0xff]  ;;  %v945_v62 = vpop.permute.xlu1 %944  ;;  %v1521_v2 = vld [vmem:[#allocation2 + $0x170] sm:$0xff] }
  0xdb   : > { %3066 = vmatprep.subr.mxu1 %v3407_v1  ;;  %510 = vrot.lane.b32.xlu1 %v3795_v59, %s3409_s17  ;;  %984 = vst.msk [vmem:[#allocation2 + $0x1e8] sm:$0xff] %vm431_vm0, %v943_v58  ;;  %985 = vst.msk [vmem:[#allocation2 + $0x230] sm:$0xff] %vm431_vm0, %v945_v62  ;;  %s3417_s17 = smov 96  }
  0xdc   : > { %3067 = vmatpush3.msra.mxu1 %v1523_v57  ;;  %3049 = vmatprep.subr.mxu0 %v3407_v1  ;;  %v1778_v57 = vld [vmem:[#allocation2 + $0x240] sm:$0xff] }
  0xdd   : > { %3068 = vmatprep.subr.mxu1 %v3407_v1  ;;  %3050 = vmatpush3.msra.mxu0 %v1435_v60 }
  0xde   : > { %3069 = vmatpush3.msra.mxu1 %v1522_v63  ;;  %3051 = vmatprep.subr.mxu0 %v3407_v1  ;;  %v814_v53 = vpop.permute.xlu0 %813  ;;  %v816_v3 = vpop.permute.xlu1 %815  ;;  %v1614_v59 = vld [vmem:[#allocation2 + $0x1f0] sm:$0xff]  ;;  %v1700_v8 = vld [vmem:[#allocation2 + $0x238] sm:$0xff]  ;;  %v1859_v63 = vld [vmem:[#allocation2 + $0x288] sm:$0xff] }
  0xdf   : > { %3052 = vmatpush3.msra.mxu0 %v1434_v0  ;;  %855 = vst.msk [vmem:[#allocation2 + $0x1d8] sm:$0xff] %vm431_vm0, %v814_v53  ;;  %3053 = vmatprep.mubr.msk.f32.mxu0 %vm3410_vm1, %v3407_v1  ;;  %856 = vst.msk [vmem:[#allocation2 + $0x220] sm:$0xff] %vm431_vm0, %v816_v3 }
  0xe0   : > { %3070 = vmatprep.subr.mxu1 %v3407_v1  ;;  %3077 = vmatprep.subr.mxu0 %v3407_v1 }
  0xe1   : > { %3054 = vmatmul.mubr.msk.f32.vlgmr.msra.gmra.mxu0 %vm1100_vm2, %v3804_v61  ;;  %3071 = vmatpush3.msra.mxu1 %v1521_v2 }
  0xe2   : > { %3078 = vmatpush3.msra.mxu0 %v1614_v59  ;;  %3072 = vmatprep.subr.mxu1 %v3407_v1  ;;  %v718_v5 = vpop.permute.xlu0 %717  ;;  %v1613_v6 = vld [vmem:[#allocation2 + $0x1e8] sm:$0xff]  ;;  %v720_v7 = vpop.permute.xlu1 %719  ;;  %v1699_v10 = vld [vmem:[#allocation2 + $0x230] sm:$0xff] }
  0xe3   : > { %3073 = vmatpush3.msra.mxu1 %v1520_v4  ;;  %759 = vst.msk [vmem:[#allocation2 + $0x1d0] sm:$0xff] %vm431_vm0, %v718_v5  ;;  %3074 = vmatprep.mubr.msk.f32.mxu1 %vm3410_vm1, %v3407_v1  ;;  %760 = vst.msk [vmem:[#allocation2 + $0x218] sm:$0xff] %vm431_vm0, %v720_v7 }
  0xe4   : > { %3079 = vmatprep.subr.mxu0 %v3407_v1  ;;  %3098 = vmatprep.subr.mxu1 %v3407_v1 }
  0xe5   : > { %3075 = vmatmul.mubr.msk.f32.vlgmr.msra.gmra.mxu1 %vm1100_vm2, %v3804_v61  ;;  %3080 = vmatpush3.msra.mxu0 %v1613_v6  ;;  %v1950_v6 = vld [vmem:[#allocation2 + $0x300] sm:$0xff] }
  0xe6   : > { %3099 = vmatpush3.msra.mxu1 %v1700_v8  ;;  %3081 = vmatprep.subr.mxu0 %v3407_v1  ;;  %v589_v11 = vpop.permute.xlu0 %588  ;;  %v1611_v12 = vld [vmem:[#allocation2 + $0x1d8] sm:$0xff]  ;;  %v591_v13 = vpop.permute.xlu1 %590  ;;  %v1697_v15 = vld [vmem:[#allocation2 + $0x220] sm:$0xff]  ;;  %v2035_v8 = vld [vmem:[#allocation2 + $0x348] sm:$0xff] }
  0xe7   : > { %3082 = vmatpush3.msra.mxu0 %v1612_v9  ;;  %630 = vst.msk [vmem:[#allocation2 + $0x1c0] sm:$0xff] %vm431_vm0, %v589_v11  ;;  %3100 = vmatprep.subr.mxu1 %v3407_v1  ;;  %631 = vst.msk [vmem:[#allocation2 + $0x208] sm:$0xff] %vm431_vm0, %v591_v13 }
  0xe8   : > { %3083 = vmatprep.subr.mxu0 %v3407_v1  ;;  %3101 = vmatpush3.msra.mxu1 %v1699_v10 }
  0xe9   : > { %3084 = vmatpush3.msra.mxu0 %v1611_v12  ;;  %3102 = vmatprep.subr.mxu1 %v3407_v1 }
  0xea   : > { %3103 = vmatpush3.msra.mxu1 %v1698_v14  ;;  %v493_v16 = vpop.permute.xlu0 %492  ;;  %3085 = vmatprep.subr.mxu0 %v3407_v1  ;;  %v1610_v17 = vld [vmem:[#allocation2 + $0x1d0] sm:$0xff]  ;;  %v495_v18 = vpop.permute.xlu1 %494  ;;  %v1696_v20 = vld [vmem:[#allocation2 + $0x218] sm:$0xff] }
  0xeb   : > { %534 = vst.msk [vmem:[#allocation2 + $0x1b8] sm:$0xff] %vm431_vm0, %v493_v16  ;;  %3104 = vmatprep.subr.mxu1 %v3407_v1  ;;  %3086 = vmatpush3.msra.mxu0 %v1610_v17  ;;  %535 = vst.msk [vmem:[#allocation2 + $0x200] sm:$0xff] %vm431_vm0, %v495_v18  ;;  %v1947_v16 = vld [vmem:[#allocation2 + $0x2e8] sm:$0xff] }
  0xec   : > { %3105 = vmatpush3.msra.mxu1 %v1697_v15  ;;  %3087 = vmatprep.subr.mxu0 %v3407_v1 }
  0xed   : > { %3088 = vmatpush3.msra.mxu0 %v1609_v19  ;;  %3106 = vmatprep.subr.mxu1 %v3407_v1  ;;  %v2032_v19 = vld [vmem:[#allocation2 + $0x330] sm:$0xff] }
  0xee   : > { %v1043_v22 = vpop.permute.xlu0 %1042  ;;  %3089 = vmatprep.subr.mxu0 %v3407_v1  ;;  %v1608_v25 = vld [vmem:[#allocation2 + $0x1c0] sm:$0xff]  ;;  %3107 = vmatpush3.msra.mxu1 %v1696_v20  ;;  %v1045_v26 = vpop.permute.xlu1 %1044  ;;  %v1694_v27 = vld [vmem:[#allocation2 + $0x208] sm:$0xff] }
  0xef   : > { %1082 = vst.msk [vmem:[#allocation2 + $0x280] sm:$0xff] %vm431_vm0, %v1043_v22  ;;  %3090 = vmatpush3.msra.mxu0 %v1608_v25  ;;  %1083 = vst.msk [vmem:[#allocation2 + $0x2c8] sm:$0xff] %vm431_vm0, %v1045_v26  ;;  %3108 = vmatprep.subr.mxu1 %v3407_v1 }
  0xf0   : > { %3109 = vmatpush3.msra.mxu1 %v1695_v21  ;;  %3091 = vmatprep.subr.mxu0 %v3407_v1 }
  0xf1   : > { %3110 = vmatprep.subr.mxu1 %v3407_v1  ;;  %3095 = vmatprep.mubr.msk.f32.mxu0 %vm3410_vm1, %v3407_v1 }
  0xf2   : > { %v947_v28 = vpop.permute.xlu0 %946  ;;  %v1607_v29 = vld [vmem:[#allocation2 + $0x1b8] sm:$0xff]  ;;  %3111 = vmatpush3.msra.mxu1 %v1694_v27  ;;  %v949_v23 = vpop.permute.xlu1 %948  ;;  %v1693_v31 = vld [vmem:[#allocation2 + $0x200] sm:$0xff]  ;;  %3116 = vmatprep.mubr.msk.f32.mxu1 %vm3410_vm1, %v3407_v1 }
  0xf3   : > { %986 = vst.msk [vmem:[#allocation2 + $0x278] sm:$0xff] %vm431_vm0, %v947_v28  ;;  %3092 = vmatpush3.msra.mxu0 %v1607_v29  ;;  %987 = vst.msk [vmem:[#allocation2 + $0x2c0] sm:$0xff] %vm431_vm0, %v949_v23  ;;  %3112 = vmatprep.subr.mxu1 %v3407_v1  ;;  %v1944_v28 = vld [vmem:[#allocation2 + $0x2d0] sm:$0xff] }
  0xf4   : > { %3093 = vmatprep.subr.mxu0 %v3407_v1  ;;  %3113 = vmatpush3.msra.mxu1 %v1693_v31 }
  0xf5   : > { %3094 = vmatpush3.msra.mxu0 %v1606_v30  ;;  %3114 = vmatprep.subr.mxu1 %v3407_v1  ;;  %v2029_v30 = vld [vmem:[#allocation2 + $0x318] sm:$0xff] }
  0xf6   : > { %v818_v24 = vpop.permute.xlu0 %817  ;;  %3119 = vmatprep.subr.mxu0 %v3407_v1  ;;  %3096 = vmatmul.mubr.msk.f32.vlgmr.msra.gmra.mxu0 %vm1100_vm2, %v3804_v61  ;;  %v1786_v33 = vld [vmem:[#allocation2 + $0x280] sm:$0xff]  ;;  %v820_v34 = vpop.permute.xlu1 %819  ;;  %v1867_v35 = vld [vmem:[#allocation2 + $0x2c8] sm:$0xff] }
  0xf7   : > { %857 = vst.msk [vmem:[#allocation2 + $0x268] sm:$0xff] %vm431_vm0, %v818_v24  ;;  %3120 = vmatpush3.msra.mxu0 %v1786_v33  ;;  %858 = vst.msk [vmem:[#allocation2 + $0x2b0] sm:$0xff] %vm431_vm0, %v820_v34  ;;  %3115 = vmatpush3.msra.mxu1 %v1692_v32 }
  0xf8   : > { %3121 = vmatprep.subr.mxu0 %v3407_v1  ;;  %3140 = vmatprep.subr.mxu1 %v3407_v1 }
  0xf9   : > { %3117 = vmatmul.mubr.msk.f32.vlgmr.msra.gmra.mxu1 %vm1100_vm2, %v3804_v61  ;;  %3137 = vmatprep.mubr.msk.f32.mxu0 %vm3410_vm1, %v3407_v1 }
  0xfa   : > { %v722_v36 = vpop.permute.xlu0 %721  ;;  %v1785_v37 = vld [vmem:[#allocation2 + $0x278] sm:$0xff]  ;;  %3141 = vmatpush3.msra.mxu1 %v1867_v35  ;;  %v724_v38 = vpop.permute.xlu1 %723  ;;  %v1866_v40 = vld [vmem:[#allocation2 + $0x2c0] sm:$0xff]  ;;  %3158 = vmatprep.mubr.msk.f32.mxu1 %vm3410_vm1, %v3407_v1 }
  0xfb   : > { %761 = vst.msk [vmem:[#allocation2 + $0x260] sm:$0xff] %vm431_vm0, %v722_v36  ;;  %3122 = vmatpush3.msra.mxu0 %v1785_v37  ;;  %762 = vst.msk [vmem:[#allocation2 + $0x2a8] sm:$0xff] %vm431_vm0, %v724_v38  ;;  %3142 = vmatprep.subr.mxu1 %v3407_v1  ;;  %v2120_v36 = vld [vmem:[#allocation2 + $0x390] sm:$0xff] }
  0xfc   : > { %3123 = vmatprep.subr.mxu0 %v3407_v1  ;;  %3143 = vmatpush3.msra.mxu1 %v1866_v40 }
  0xfd   : > { %3124 = vmatpush3.msra.mxu0 %v1784_v39  ;;  %3144 = vmatprep.subr.mxu1 %v3407_v1  ;;  %v2205_v39 = vld [vmem:[#allocation2 + $0x3d8] sm:$0xff] }
  0xfe   : > { %v593_v42 = vpop.permute.xlu0 %592  ;;  %3125 = vmatprep.subr.mxu0 %v3407_v1  ;;  %v1783_v43 = vld [vmem:[#allocation2 + $0x268] sm:$0xff]  ;;  %v595_v44 = vpop.permute.xlu1 %594  ;;  %3145 = vmatpush3.msra.mxu1 %v1865_v41  ;;  %v1864_v45 = vld [vmem:[#allocation2 + $0x2b0] sm:$0xff] }
  0xff   : > { %632 = vst.msk [vmem:[#allocation2 + $0x250] sm:$0xff] %vm431_vm0, %v593_v42  ;;  %3126 = vmatpush3.msra.mxu0 %v1783_v43  ;;  %633 = vst.msk [vmem:[#allocation2 + $0x298] sm:$0xff] %vm431_vm0, %v595_v44  ;;  %3146 = vmatprep.subr.mxu1 %v3407_v1 }
 0x100   : > { %3127 = vmatprep.subr.mxu0 %v3407_v1  ;;  %3147 = vmatpush3.msra.mxu1 %v1864_v45  ;;  %v2117_v45 = vld [vmem:[#allocation2 + $0x378] sm:$0xff] }
 0x101   : > { %3148 = vmatprep.subr.mxu1 %v3407_v1 }
 0x102   : > { %v497_v47 = vpop.permute.xlu0 %496  ;;  %v1782_v48 = vld [vmem:[#allocation2 + $0x260] sm:$0xff]  ;;  %v499_v49 = vpop.permute.xlu1 %498  ;;  %v1863_v50 = vld [vmem:[#allocation2 + $0x2a8] sm:$0xff] }
 0x103   : > { %536 = vst.msk [vmem:[#allocation2 + $0x248] sm:$0xff] %vm431_vm0, %v497_v47  ;;  %3128 = vmatpush3.msra.mxu0 %v1782_v48  ;;  %537 = vst.msk [vmem:[#allocation2 + $0x290] sm:$0xff] %vm431_vm0, %v499_v49  ;;  %3149 = vmatpush3.msra.mxu1 %v1863_v50  ;;  %v2202_v48 = vld [vmem:[#allocation2 + $0x3c0] sm:$0xff] }
 0x104   : > { %3129 = vmatprep.subr.mxu0 %v3407_v1  ;;  %3150 = vmatprep.subr.mxu1 %v3407_v1 }
 0x105   : > { %3130 = vmatpush3.msra.mxu0 %v1781_v46  ;;  %3151 = vmatpush3.msra.mxu1 %v1862_v51 }
 0x106   : > { %v1047_v52 = vpop.permute.xlu0 %1046  ;;  %3131 = vmatprep.subr.mxu0 %v3407_v1  ;;  %v1780_v54 = vld [vmem:[#allocation2 + $0x250] sm:$0xff]  ;;  %v1049_v55 = vpop.permute.xlu1 %1048  ;;  %3152 = vmatprep.subr.mxu1 %v3407_v1  ;;  %v1861_v56 = vld [vmem:[#allocation2 + $0x298] sm:$0xff] }
 0x107   : > { %1084 = vst.msk [vmem:[#allocation2 + $0x310] sm:$0xff] %vm431_vm0, %v1047_v52  ;;  %3132 = vmatpush3.msra.mxu0 %v1780_v54  ;;  %1085 = vst.msk [vmem:[#allocation2 + $0x358] sm:$0xff] %vm431_vm0, %v1049_v55  ;;  %3153 = vmatpush3.msra.mxu1 %v1861_v56  ;;  %v2114_v55 = vld [vmem:[#allocation2 + $0x360] sm:$0xff] }
 0x108   : > { %3133 = vmatprep.subr.mxu0 %v3407_v1  ;;  %3154 = vmatprep.subr.mxu1 %v3407_v1 }
 0x10a   : > { %v951_v58 = vpop.permute.xlu0 %950  ;;  %v1779_v60 = vld [vmem:[#allocation2 + $0x248] sm:$0xff]  ;;  %v1860_v62 = vld [vmem:[#allocation2 + $0x290] sm:$0xff] }
 0x10b   : > { %988 = vst.msk [vmem:[#allocation2 + $0x308] sm:$0xff] %vm431_vm0, %v951_v58  ;;  %3134 = vmatpush3.msra.mxu0 %v1779_v60  ;;  %v953_v0 = vpop.permute.xlu1 %952  ;;  %3155 = vmatpush3.msra.mxu1 %v1860_v62  ;;  %v3411_v60 = vmov 0   ;;  %v2199_v62 = vld [vmem:[#allocation2 + $0x3a8] sm:$0xff] }
 0x10c   : > { %989 = vst.msk [vmem:[#allocation2 + $0x350] sm:$0xff] %vm431_vm0, %v953_v0  ;;  %3135 = vmatprep.subr.mxu0 %v3407_v1  ;;  %3156 = vmatprep.subr.mxu1 %v3407_v1 }
 0x10d   : > { %3136 = vmatpush3.msra.mxu0 %v1778_v57  ;;  %3157 = vmatpush3.msra.mxu1 %v1859_v63  ;;  %v4094_v63 = vld [vmem:[%s4251_s1] sm:$0xff] }
 0x10e   : > { %v822_v53 = vpop.permute.xlu0 %821  ;;  %3161 = vmatprep.subr.mxu0 %v3407_v1  ;;  %3138 = vmatmul.mubr.msk.f32.vlgmr.msra.gmra.mxu0 %vm1100_vm2, %v3804_v61  ;;  %v1952_v2 = vld [vmem:[#allocation2 + $0x310] sm:$0xff]  ;;  %v2037_v3 = vld [vmem:[#allocation2 + $0x358] sm:$0xff] }
 0x10f   : > { %859 = vst.msk [vmem:[#allocation2 + $0x2f8] sm:$0xff] %vm431_vm0, %v822_v53  ;;  %3162 = vmatpush3.msra.mxu0 %v1952_v2  ;;  %v824_v59 = vpop.permute.xlu1 %823  ;;  %3182 = vmatprep.subr.mxu1 %v3407_v1 }
 0x110   : > { %860 = vst.msk [vmem:[#allocation2 + $0x340] sm:$0xff] %vm431_vm0, %v824_v59  ;;  %3163 = vmatprep.subr.mxu0 %v3407_v1  ;;  %3159 = vmatmul.mubr.msk.f32.vlgmr.msra.gmra.mxu1 %vm1100_vm2, %v3804_v61 }
 0x111   : > { %3183 = vmatpush3.msra.mxu1 %v2037_v3  ;;  %3179 = vmatprep.mubr.msk.f32.mxu0 %vm3410_vm1, %v3407_v1 }
 0x112   : > { %v726_v4 = vpop.permute.xlu0 %725  ;;  %v1951_v5 = vld [vmem:[#allocation2 + $0x308] sm:$0xff]  ;;  %3184 = vmatprep.subr.mxu1 %v3407_v1  ;;  %3200 = vmatprep.mubr.msk.f32.mxu1 %vm3410_vm1, %v3407_v1 }
 0x113   : > { %763 = vst.msk [vmem:[#allocation2 + $0x2f0] sm:$0xff] %vm431_vm0, %v726_v4  ;;  %3164 = vmatpush3.msra.mxu0 %v1951_v5  ;;  %v2036_v7 = vld [vmem:[#allocation2 + $0x350] sm:$0xff]  ;;  %3339 = vset.pattern.permute.xlu0 %v3411_v60  ;;  %v2290_v4 = vld [vmem:[#allocation2 + $0x420] sm:$0xff] }
 0x114   : > { %v728_v9 = vpop.permute.xlu1 %727  ;;  %3165 = vmatprep.subr.mxu0 %v3407_v1  ;;  %3185 = vmatpush3.msra.mxu1 %v2036_v7  ;;  %v2375_v7 = vld [vmem:[#allocation2 + $0x468] sm:$0xff] }
 0x115   : > { %764 = vst.msk [vmem:[#allocation2 + $0x338] sm:$0xff] %vm431_vm0, %v728_v9  ;;  %3166 = vmatpush3.msra.mxu0 %v1950_v6  ;;  %3186 = vmatprep.subr.mxu1 %v3407_v1 }
 0x116   : > { %v597_v10 = vpop.permute.xlu0 %596  ;;  %3167 = vmatprep.subr.mxu0 %v3407_v1  ;;  %v1949_v11 = vld [vmem:[#allocation2 + $0x2f8] sm:$0xff]  ;;  %3187 = vmatpush3.msra.mxu1 %v2035_v8 }
 0x117   : > { %634 = vst.msk [vmem:[#allocation2 + $0x2e0] sm:$0xff] %vm431_vm0, %v597_v10  ;;  %3168 = vmatpush3.msra.mxu0 %v1949_v11  ;;  %3188 = vmatprep.subr.mxu1 %v3407_v1  ;;  %v2034_v12 = vld [vmem:[#allocation2 + $0x340] sm:$0xff] }
 0x118   : > { %v599_v13 = vpop.permute.xlu1 %598  ;;  %3169 = vmatprep.subr.mxu0 %v3407_v1  ;;  %3189 = vmatpush3.msra.mxu1 %v2034_v12 }
 0x119   : > { %635 = vst.msk [vmem:[#allocation2 + $0x328] sm:$0xff] %vm431_vm0, %v599_v13  ;;  %3190 = vmatprep.subr.mxu1 %v3407_v1 }
 0x11a   : > { %v501_v14 = vpop.permute.xlu0 %500  ;;  %v1948_v15 = vld [vmem:[#allocation2 + $0x2f0] sm:$0xff] }
 0x11b   : > { %538 = vst.msk [vmem:[#allocation2 + $0x2d8] sm:$0xff] %vm431_vm0, %v501_v14  ;;  %3170 = vmatpush3.msra.mxu0 %v1948_v15  ;;  %v2287_v15 = vld [vmem:[#allocation2 + $0x408] sm:$0xff] }
 0x11c   : > { %v503_v17 = vpop.permute.xlu1 %502  ;;  %3171 = vmatprep.subr.mxu0 %v3407_v1  ;;  %v2033_v18 = vld [vmem:[#allocation2 + $0x338] sm:$0xff] }
 0x11d   : > { %539 = vst.msk [vmem:[#allocation2 + $0x320] sm:$0xff] %vm431_vm0, %v503_v17  ;;  %3172 = vmatpush3.msra.mxu0 %v1947_v16  ;;  %3191 = vmatpush3.msra.mxu1 %v2033_v18  ;;  %v2372_v18 = vld [vmem:[#allocation2 + $0x450] sm:$0xff] }
 0x11e   : > { %v1051_v20 = vpop.permute.xlu0 %1050  ;;  %3173 = vmatprep.subr.mxu0 %v3407_v1  ;;  %v1946_v21 = vld [vmem:[#allocation2 + $0x2e0] sm:$0xff]  ;;  %3192 = vmatprep.subr.mxu1 %v3407_v1 }
 0x11f   : > { %1086 = vst.msk [vmem:[#allocation2 + $0x3a0] sm:$0xff] %vm431_vm0, %v1051_v20  ;;  %3174 = vmatpush3.msra.mxu0 %v1946_v21  ;;  %3193 = vmatpush3.msra.mxu1 %v2032_v19 }
 0x120   : > { %v1053_v22 = vpop.permute.xlu1 %1052  ;;  %3175 = vmatprep.subr.mxu0 %v3407_v1  ;;  %3194 = vmatprep.subr.mxu1 %v3407_v1  ;;  %v2031_v25 = vld [vmem:[#allocation2 + $0x328] sm:$0xff] }
 0x121   : > { %1087 = vst.msk [vmem:[#allocation2 + $0x3e8] sm:$0xff] %vm431_vm0, %v1053_v22  ;;  %3195 = vmatpush3.msra.mxu1 %v2031_v25  ;;  %v2284_v22 = vld [vmem:[#allocation2 + $0x3f0] sm:$0xff] }
 0x122   : > { %v955_v26 = vpop.permute.xlu0 %954  ;;  %v1945_v27 = vld [vmem:[#allocation2 + $0x2d8] sm:$0xff]  ;;  %3196 = vmatprep.subr.mxu1 %v3407_v1 }
 0x123   : > { %990 = vst.msk [vmem:[#allocation2 + $0x398] sm:$0xff] %vm431_vm0, %v955_v26  ;;  %3176 = vmatpush3.msra.mxu0 %v1945_v27  ;;  %v2369_v26 = vld [vmem:[#allocation2 + $0x438] sm:$0xff] }
 0x124   : > { %v957_v29 = vpop.permute.xlu1 %956  ;;  %3177 = vmatprep.subr.mxu0 %v3407_v1  ;;  %v2030_v23 = vld [vmem:[#allocation2 + $0x320] sm:$0xff] }
 0x125   : > { %991 = vst.msk [vmem:[#allocation2 + $0x3e0] sm:$0xff] %vm431_vm0, %v957_v29  ;;  %3178 = vmatpush3.msra.mxu0 %v1944_v28  ;;  %3197 = vmatpush3.msra.mxu1 %v2030_v23 }
 0x126   : > { %v826_v31 = vpop.permute.xlu0 %825  ;;  %3203 = vmatprep.subr.mxu0 %v3407_v1  ;;  %3180 = vmatmul.mubr.msk.f32.vlgmr.msra.gmra.mxu0 %vm1100_vm2, %v3804_v61  ;;  %v2122_v32 = vld [vmem:[#allocation2 + $0x3a0] sm:$0xff] }
 0x127   : > { %861 = vst.msk [vmem:[#allocation2 + $0x388] sm:$0xff] %vm431_vm0, %v826_v31  ;;  %3204 = vmatpush3.msra.mxu0 %v2122_v32  ;;  %3198 = vmatprep.subr.mxu1 %v3407_v1 }
 0x128   : > { %v828_v24 = vpop.permute.xlu1 %827  ;;  %3199 = vmatpush3.msra.mxu1 %v2029_v30  ;;  %3205 = vmatprep.subr.mxu0 %v3407_v1  ;;  %v2207_v33 = vld [vmem:[#allocation2 + $0x3e8] sm:$0xff] }
 0x129   : > { %862 = vst.msk [vmem:[#allocation2 + $0x3d0] sm:$0xff] %vm431_vm0, %v828_v24  ;;  %3224 = vmatprep.subr.mxu1 %v3407_v1  ;;  %3201 = vmatmul.mubr.msk.f32.vlgmr.msra.gmra.mxu1 %vm1100_vm2, %v3804_v61 }
 0x12a   : > { %v730_v34 = vpop.permute.xlu0 %729  ;;  %v2121_v35 = vld [vmem:[#allocation2 + $0x398] sm:$0xff]  ;;  %3225 = vmatpush3.msra.mxu1 %v2207_v33  ;;  %3221 = vmatprep.mubr.msk.f32.mxu0 %vm3410_vm1, %v3407_v1 }
 0x12b   : > { %765 = vst.msk [vmem:[#allocation2 + $0x380] sm:$0xff] %vm431_vm0, %v730_v34  ;;  %3206 = vmatpush3.msra.mxu0 %v2121_v35  ;;  %3226 = vmatprep.subr.mxu1 %v3407_v1 }
 0x12c   : > { %v732_v37 = vpop.permute.xlu1 %731  ;;  %3207 = vmatprep.subr.mxu0 %v3407_v1  ;;  %v2206_v38 = vld [vmem:[#allocation2 + $0x3e0] sm:$0xff]  ;;  %3242 = vmatprep.mubr.msk.f32.mxu1 %vm3410_vm1, %v3407_v1 }
 0x12d   : > { %766 = vst.msk [vmem:[#allocation2 + $0x3c8] sm:$0xff] %vm431_vm0, %v732_v37  ;;  %3208 = vmatpush3.msra.mxu0 %v2120_v36  ;;  %3227 = vmatpush3.msra.mxu1 %v2206_v38 }
 0x12e   : > { %v601_v61 = vpop.permute.xlu0 %600  ;;  %3209 = vmatprep.subr.mxu0 %v3407_v1  ;;  %v2119_v40 = vld [vmem:[#allocation2 + $0x388] sm:$0xff]  ;;  %3228 = vmatprep.subr.mxu1 %v3407_v1 }
 0x12f   : > { %636 = vst.msk [vmem:[#allocation2 + $0x370] sm:$0xff] %vm431_vm0, %v601_v61  ;;  %3210 = vmatpush3.msra.mxu0 %v2119_v40  ;;  %3229 = vmatpush3.msra.mxu1 %v2205_v39  ;;  %v2455_v61 = vld [vmem:[%s4252_s2] sm:$0xff] }
 0x130   : > { %v603_v41 = vpop.permute.xlu1 %602  ;;  %3211 = vmatprep.subr.mxu0 %v3407_v1  ;;  %3230 = vmatprep.subr.mxu1 %v3407_v1  ;;  %v2204_v42 = vld [vmem:[#allocation2 + $0x3d0] sm:$0xff] }
 0x131   : > { %637 = vst.msk [vmem:[#allocation2 + $0x3b8] sm:$0xff] %vm431_vm0, %v603_v41  ;;  %3231 = vmatpush3.msra.mxu1 %v2204_v42 }
 0x132   : > { %v505_v43 = vpop.permute.xlu0 %504  ;;  %v2118_v44 = vld [vmem:[#allocation2 + $0x380] sm:$0xff]  ;;  %3232 = vmatprep.subr.mxu1 %v3407_v1 }
 0x133   : > { %540 = vst.msk [vmem:[#allocation2 + $0x368] sm:$0xff] %vm431_vm0, %v505_v43  ;;  %3212 = vmatpush3.msra.mxu0 %v2118_v44 }
 0x134   : > { %v507_v46 = vpop.permute.xlu1 %506  ;;  %3213 = vmatprep.subr.mxu0 %v3407_v1  ;;  %v2203_v47 = vld [vmem:[#allocation2 + $0x3c8] sm:$0xff] }
 0x135   : > { %541 = vst.msk [vmem:[#allocation2 + $0x3b0] sm:$0xff] %vm431_vm0, %v507_v46  ;;  %3214 = vmatpush3.msra.mxu0 %v2117_v45  ;;  %3233 = vmatpush3.msra.mxu1 %v2203_v47 }
 0x136   : > { %v1055_v49 = vpop.permute.xlu0 %1054  ;;  %3215 = vmatprep.subr.mxu0 %v3407_v1  ;;  %v2116_v50 = vld [vmem:[#allocation2 + $0x370] sm:$0xff]  ;;  %3234 = vmatprep.subr.mxu1 %v3407_v1 }
 0x137   : > { %1088 = vst.msk [vmem:[#allocation2 + $0x430] sm:$0xff] %vm431_vm0, %v1055_v49  ;;  %3216 = vmatpush3.msra.mxu0 %v2116_v50  ;;  %3235 = vmatpush3.msra.mxu1 %v2202_v48 }
 0x138   : > { %v1057_v51 = vpop.permute.xlu1 %1056  ;;  %3217 = vmatprep.subr.mxu0 %v3407_v1  ;;  %3236 = vmatprep.subr.mxu1 %v3407_v1  ;;  %v2201_v52 = vld [vmem:[#allocation2 + $0x3b8] sm:$0xff] }
 0x139   : > { %1089 = vst.msk [vmem:[#allocation2 + $0x478] sm:$0xff] %vm431_vm0, %v1057_v51  ;;  %3237 = vmatpush3.msra.mxu1 %v2201_v52 }
 0x13a   : > { %v2115_v54 = vld [vmem:[#allocation2 + $0x368] sm:$0xff]  ;;  %3238 = vmatprep.subr.mxu1 %v3407_v1 }
 0x13b   : > { %v959_v56 = vpop.permute.xlu0 %958  ;;  %3218 = vmatpush3.msra.mxu0 %v2115_v54 }
 0x13c   : > { %992 = vst.msk [vmem:[#allocation2 + $0x428] sm:$0xff] %vm431_vm0, %v959_v56  ;;  %v961_v57 = vpop.permute.xlu1 %960  ;;  %3219 = vmatprep.subr.mxu0 %v3407_v1  ;;  %v2200_v58 = vld [vmem:[#allocation2 + $0x3b0] sm:$0xff] }
 0x13d   : > { %993 = vst.msk [vmem:[#allocation2 + $0x470] sm:$0xff] %vm431_vm0, %v961_v57  ;;  %3220 = vmatpush3.msra.mxu0 %v2114_v55  ;;  %3239 = vmatpush3.msra.mxu1 %v2200_v58 }
 0x13e   : > { %3245 = vmatprep.subr.mxu0 %v3407_v1  ;;  %3222 = vmatmul.mubr.msk.f32.vlgmr.msra.gmra.mxu0 %vm1100_vm2, %v4094_v63  ;;  %v2292_v0 = vld [vmem:[#allocation2 + $0x430] sm:$0xff] }
 0x13f   : > { %3246 = vmatpush3.msra.mxu0 %v2292_v0  ;;  %3240 = vmatprep.subr.mxu1 %v3407_v1  ;;  %v2484_v0 = vld [vmem:[%s4255_s5] sm:$0xff] }
 0x140   : > { %v830_v53 = vpop.permute.xlu0 %829  ;;  %3241 = vmatpush3.msra.mxu1 %v2199_v62  ;;  %3247 = vmatprep.subr.mxu0 %v3407_v1  ;;  %v2377_v2 = vld [vmem:[#allocation2 + $0x478] sm:$0xff] }
 0x141   : > { %863 = vst.msk [vmem:[#allocation2 + $0x418] sm:$0xff] %vm431_vm0, %v830_v53  ;;  %v832_v3 = vpop.permute.xlu1 %831  ;;  %3266 = vmatprep.subr.mxu1 %v3407_v1  ;;  %3243 = vmatmul.mubr.msk.f32.vlgmr.msra.gmra.mxu1 %vm1100_vm2, %v4094_v63 }
 0x142   : > { %864 = vst.msk [vmem:[#allocation2 + $0x460] sm:$0xff] %vm431_vm0, %v832_v3  ;;  %3267 = vmatpush3.msra.mxu1 %v2377_v2  ;;  %3263 = vmatprep.mubr.msk.f32.mxu0 %vm3410_vm1, %v3407_v1  ;;  %v2486_v2 = vmul.f32 1.442695, %v2484_v0 }
 0x143   : > { %v2291_v59 = vld [vmem:[#allocation2 + $0x428] sm:$0xff]  ;;  %3268 = vmatprep.subr.mxu1 %v3407_v1  ;;  %3284 = vmatprep.mubr.msk.f32.mxu1 %vm3410_vm1, %v3407_v1 }
 0x144   : > { %v734_v5 = vpop.permute.xlu0 %733  ;;  %3248 = vmatpush3.msra.mxu0 %v2291_v59  ;;  %v2376_v6 = vld [vmem:[#allocation2 + $0x470] sm:$0xff]  ;;  %3340 = vpow2.f32 %v2486_v2 }
 0x145   : > { %767 = vst.msk [vmem:[#allocation2 + $0x410] sm:$0xff] %vm431_vm0, %v734_v5  ;;  %v736_v8 = vpop.permute.xlu1 %735  ;;  %3249 = vmatprep.subr.mxu0 %v3407_v1  ;;  %3269 = vmatpush3.msra.mxu1 %v2376_v6 }
 0x146   : > { %768 = vst.msk [vmem:[#allocation2 + $0x458] sm:$0xff] %vm431_vm0, %v736_v8  ;;  %3250 = vmatpush3.msra.mxu0 %v2290_v4  ;;  %3270 = vmatprep.subr.mxu1 %v3407_v1  ;;  %v2492_v8 = vld [vmem:[%s4256_s6] sm:$0xff] }
 0x147   : > { %3251 = vmatprep.subr.mxu0 %v3407_v1  ;;  %3271 = vmatpush3.msra.mxu1 %v2375_v7 }
 0x148   : > { %v605_v9 = vpop.permute.xlu0 %604  ;;  %v2289_v10 = vld [vmem:[#allocation2 + $0x418] sm:$0xff]  ;;  %3272 = vmatprep.subr.mxu1 %v3407_v1 }
 0x149   : > { %638 = vst.msk [vmem:[#allocation2 + $0x400] sm:$0xff] %vm431_vm0, %v605_v9  ;;  %3252 = vmatpush3.msra.mxu0 %v2289_v10  ;;  %v607_v11 = vpop.permute.xlu1 %606  ;;  %v2374_v12 = vld [vmem:[#allocation2 + $0x460] sm:$0xff] }
 0x14a   : > { %639 = vst.msk [vmem:[#allocation2 + $0x448] sm:$0xff] %vm431_vm0, %v607_v11  ;;  %3253 = vmatprep.subr.mxu0 %v3407_v1  ;;  %3273 = vmatpush3.msra.mxu1 %v2374_v12 }
 0x14b   : > { %3274 = vmatprep.subr.mxu1 %v3407_v1 }
 0x14c   : > { %v509_v13 = vpop.permute.xlu0 %508  ;;  %v2288_v14 = vld [vmem:[#allocation2 + $0x410] sm:$0xff] }
 0x14d   : > { %542 = vst.msk [vmem:[#allocation2 + $0x3f8] sm:$0xff] %vm431_vm0, %v509_v13  ;;  %3254 = vmatpush3.msra.mxu0 %v2288_v14  ;;  %v511_v16 = vpop.permute.xlu1 %510  ;;  %v2373_v17 = vld [vmem:[#allocation2 + $0x458] sm:$0xff] }
 0x14e   : > { %543 = vst.msk [vmem:[#allocation2 + $0x440] sm:$0xff] %vm431_vm0, %v511_v16  ;;  %3255 = vmatprep.subr.mxu0 %v3407_v1  ;;  %3275 = vmatpush3.msra.mxu1 %v2373_v17  ;;  %v2485_v16 = vld [vmem:[%s4255_s5 + $0x8] sm:$0xff] }
 0x14f   : > { %3256 = vmatpush3.msra.mxu0 %v2287_v15  ;;  %3276 = vmatprep.subr.mxu1 %v3407_v1  ;;  %v2488_v17 = vmul.f32 1.442695, %v2485_v16 }
 0x150   : > { %3257 = vmatprep.subr.mxu0 %v3407_v1  ;;  %v2286_v19 = vld [vmem:[#allocation2 + $0x400] sm:$0xff]  ;;  %3277 = vmatpush3.msra.mxu1 %v2372_v18 }
 0x151   : > { %3258 = vmatpush3.msra.mxu0 %v2286_v19  ;;  %3278 = vmatprep.subr.mxu1 %v3407_v1  ;;  %v2371_v20 = vld [vmem:[#allocation2 + $0x448] sm:$0xff]  ;;  %v3341_v6 = vpop.eup %3340  ;;  %3342 = vpow2.f32 %v2488_v17 }
 0x152   : > { %3259 = vmatprep.subr.mxu0 %v3407_v1  ;;  %3279 = vmatpush3.msra.mxu1 %v2371_v20 }
 0x153   : > { %3280 = vmatprep.subr.mxu1 %v3407_v1 }
 0x154   : > { %v2285_v21 = vld [vmem:[#allocation2 + $0x3f8] sm:$0xff] }
 0x155   : > { %3260 = vmatpush3.msra.mxu0 %v2285_v21  ;;  %v2370_v25 = vld [vmem:[#allocation2 + $0x440] sm:$0xff] }
 0x156   : > { %3261 = vmatprep.subr.mxu0 %v3407_v1  ;;  %3281 = vmatpush3.msra.mxu1 %v2370_v25 }
 0x157   : > { %3262 = vmatpush3.msra.mxu0 %v2284_v22  ;;  %3282 = vmatprep.subr.mxu1 %v3407_v1 }
 0x158   : > { %3264 = vmatmul.mubr.msk.f32.vlgmr.msra.gmra.mxu0 %vm1100_vm2, %v4094_v63  ;;  %3283 = vmatpush3.msra.mxu1 %v2369_v26  ;;  %v2493_v26 = vld [vmem:[%s4256_s6 + $0x8] sm:$0xff] }
 0x159   : > { %3285 = vmatmul.mubr.msk.f32.vlgmr.msra.gmra.mxu1 %vm1100_vm2, %v4094_v63 }
 0x15e   : > { %v3343_v22 = vpop.eup %3342 }
 0x16f   : > { %v1170_v27 = vpop.f32.mrf.mxu0 }
 0x170   : > { %1174 = vst.msk [vmem:[#allocation3] sm:$0xff] %vm431_vm0, %v1170_v27 }
 0x171   : > { %v2971_v28 = vpop.f32.mrf.mxu0 }
 0x173   : > { %v1251_v29 = vpop.f32.mrf.mxu1 }
 0x174   : > { %1256 = vrot.lane.b32.xlu0 %v1251_v29, %s3412_s12 }
 0x175   : > { %v2992_v23 = vpop.f32.mrf.mxu1 }
 0x188   : > { %v1337_v30 = vpop.f32.mrf.mxu0 }
 0x189   : > { %1342 = vrot.lane.b32.xlu0 %v1337_v30, %s3413_s13 }
 0x18a   : > { %v3013_v1 = vpop.f32.mrf.mxu0 }
 0x18d   : > { %v1423_v31 = vpop.f32.mrf.mxu1 }
 0x18e   : > { %1428 = vrot.lane.b32.xlu0 %v1423_v31, %s3414_s14 }
 0x18f   : > { %v3034_v32 = vpop.f32.mrf.mxu1 }
 0x1a1   : > { %v1509_v24 = vpop.f32.mrf.mxu0 }
 0x1a2   : > { %1514 = vrot.lane.b32.xlu0 %v1509_v24, %s3415_s15 }
 0x1a3   : > { %v3055_v33 = vpop.f32.mrf.mxu0 }
 0x1a5   : > { %v1595_v34 = vpop.f32.mrf.mxu1 }
 0x1a6   : > { %1600 = vrot.lane.b32.xlu0 %v1595_v34, %s3416_s16  ;;  %v2515_v34 = vld [vmem:[#allocation4] sm:$0x1] }
 0x1a7   : > { %v3076_v35 = vpop.f32.mrf.mxu1 }
 0x1a8   : > { %v2470_v35 = vld [vmem:[%s4253_s3] sm:$0xff] }
 0x1b6   : > { %v1681_v36 = vpop.f32.mrf.mxu0 }
 0x1b7   : > { %1686 = vrot.lane.b32.xlu0 %v1681_v36, %s3417_s17 }
 0x1b8   : > { %v3097_v37 = vpop.f32.mrf.mxu0 }
 0x1b9   : > { %v1767_v38 = vpop.f32.mrf.mxu1 }
 0x1bb   : > { %1772 = vrot.lane.b32.xlu0 %v1767_v38, %s3418_s18  ;;  %v3118_v39 = vpop.f32.mrf.mxu1 }
 0x1bf   : > { %2458 = vperm.xlu0 %3339, %v2455_v61  }
 0x1ce   : > { %v1853_v40 = vpop.f32.mrf.mxu0 }
 0x1cf   : > { %1857 = vst.msk [vmem:[#allocation3 + $0x8] sm:$0xff] %vm431_vm0, %v1853_v40 }
 0x1d0   : > { %v3139_v41 = vpop.f32.mrf.mxu0  ;;  %v1934_v42 = vpop.f32.mrf.mxu1 }
 0x1d1   : > { %1939 = vrot.lane.b32.xlu1 %v1934_v42, %s3412_s12 }
 0x1d2   : > { %v3160_v43 = vpop.f32.mrf.mxu1 }
 0x1e6   : > { %v2019_v44 = vpop.f32.mrf.mxu0  ;;  %v1257_v45 = vpop.permute.xlu0 %1256 }
 0x1e7   : > { %2024 = vrot.lane.b32.xlu1 %v2019_v44, %s3413_s13  ;;  %1260 = vst.msk [vmem:[#allocation3] sm:$0xff] %vm1259_vm3, %v1257_v45  ;;  %s2790_s13 = sshll.u32 %s3535_s30, 4 }
 0x1e8   : > { %v3181_v46 = vpop.f32.mrf.mxu0 }
 0x1e9   : > { %v2104_v47 = vpop.f32.mrf.mxu1 }
 0x1eb   : > { %v3202_v48 = vpop.f32.mrf.mxu1  ;;  %2109 = vrot.lane.b32.xlu1 %v2104_v47, %s3414_s14 }
 0x1ec   : > { %v2480_v48 = vld [vmem:[%s4254_s4] sm:$0x1] }
 0x1fb   : > { %v1343_v49 = vpop.permute.xlu0 %1342 }
 0x1fc   : > { %1346 = vst.msk [vmem:[#allocation3] sm:$0xff] %vm1345_vm4, %v1343_v49 }
 0x1fe   : > { %v2189_v50 = vpop.f32.mrf.mxu0 }
 0x1ff   : > { %2194 = vrot.lane.b32.xlu1 %v2189_v50, %s3415_s15  ;;  %s409_s15 = scalar_lea.vmem %s4260_s10, %s3535_s30 }
 0x200   : > { %v3223_v51 = vpop.f32.mrf.mxu0  ;;  %v1429_v52 = vpop.permute.xlu0 %1428  ;;  %2516 = vst.msk [vmem:[%s409_s15] sm:$0x1] %vm2513_vm10, %v2515_v34 }
 0x201   : > { %v2274_v54 = vpop.f32.mrf.mxu1  ;;  %1432 = vst.msk [vmem:[#allocation3] sm:$0xff] %vm1431_vm5, %v1429_v52 }
 0x203   : > { %v3244_v55 = vpop.f32.mrf.mxu1  ;;  %2279 = vrot.lane.b32.xlu1 %v2274_v54, %s3416_s16  ;;  %s4199_s16 = scalar_lea.hbm %s4258_s8, %s2787_s26  ;;  %s3419_s26 = smov [#allocation5]  }
 0x204   : > { %s3349_s14 = sshll.u32 %s3419_s26, 4  ;;  %s3350_s14 = int_to_ptr.vmem [resolvable:$false] %s3349_s14 }
 0x205   : > { %s3351_s15 = scalar_lea.vmem %s3350_s14, 32 }
 0x214   : > { %v1515_v56 = vpop.permute.xlu0 %1514 }
 0x215   : > { %1518 = vst.msk [vmem:[#allocation3] sm:$0xff] %vm1517_vm6, %v1515_v56 }
 0x218   : > { %v2359_v57 = vpop.f32.mrf.mxu0  ;;  %v1601_v58 = vpop.permute.xlu0 %1600 }
 0x219   : > { %2364 = vrot.lane.b32.xlu1 %v2359_v57, %s3417_s17  ;;  %v2444_v60 = vpop.f32.mrf.mxu1  ;;  %1604 = vst.msk [vmem:[#allocation3] sm:$0xff] %vm1603_vm7, %v1601_v58 }
 0x21a   : > { %v3265_v62 = vpop.f32.mrf.mxu0 }
 0x21b   : > { %v3286_v63 = vpop.f32.mrf.mxu1 }
 0x21d   : > { %2449 = vrot.lane.b32.xlu1 %v2444_v60, %s3418_s18  ;;  %s414_s18 = scalar_lea.vmem %s4261_s11, %s2790_s13 }
 0x229   : > { %v1687_v53 = vpop.permute.xlu0 %1686 }
 0x22a   : > { %1690 = vst.msk [vmem:[#allocation3] sm:$0xff] %vm1689_vm8, %v1687_v53 }
 0x22d   : > { %v1773_v3 = vpop.permute.xlu0 %1772 }
 0x22e   : > { %1776 = vst.msk [vmem:[#allocation3] sm:$0xff] %vm1775_vm9, %v1773_v3 }
 0x235   : > { %v2453_v59 = vld [vmem:[#allocation3] sm:$0xff] }
 0x23a   : > { %v2459_v4 = vpop.permute.xlu0 %2458 }
 0x23b   : > { %v2461_v5 = vadd.f32 %v2459_v4, %v2453_v59 }
 0x23d   : > { %v2463_v7 = vmax.f32 %v2461_v5, 0.0 }
 0x23f   : > { %v2490_v9 = vmul.f32 %v3341_v6, %v2463_v7 }
 0x241   : > { %v2494_v10 = vadd.f32 %v2492_v8, %v2490_v9 }
 0x243   : > { %2496 = vst [vmem:[%s414_s18] sm:$0xff] %v2494_v10  ;;  %v1940_v11 = vpop.permute.xlu1 %1939  ;;  %v2498_v29 = vmul.f32 0.5, %v2494_v10 }
 0x244   : > { %1942 = vst.msk [vmem:[#allocation3 + $0x8] sm:$0xff] %vm1259_vm3, %v1940_v11 }
 0x245   : > { %v2500_v1 = vmul.f32 %v2498_v29, %v2494_v10 }
 0x247   : > { %v2502_v32 = vsub.f32 -0.9189385, %v2500_v1 }
 0x259   : > { %v2025_v12 = vpop.permute.xlu1 %2024 }
 0x25a   : > { %2027 = vst.msk [vmem:[#allocation3 + $0x8] sm:$0xff] %vm1345_vm4, %v2025_v12 }
 0x25d   : > { %v2110_v13 = vpop.permute.xlu1 %2109 }
 0x25e   : > { %2112 = vst.msk [vmem:[#allocation3 + $0x8] sm:$0xff] %vm1431_vm5, %v2110_v13 }
 0x271   : > { %v2195_v14 = vpop.permute.xlu1 %2194 }
 0x272   : > { %2197 = vst.msk [vmem:[#allocation3 + $0x8] sm:$0xff] %vm1517_vm6, %v2195_v14 }
 0x275   : > { %v2280_v15 = vpop.permute.xlu1 %2279 }
 0x276   : > { %2282 = vst.msk [vmem:[#allocation3 + $0x8] sm:$0xff] %vm1603_vm7, %v2280_v15 }
 0x28b   : > { %v2365_v18 = vpop.permute.xlu1 %2364 }
 0x28c   : > { %2367 = vst.msk [vmem:[#allocation3 + $0x8] sm:$0xff] %vm1689_vm8, %v2365_v18 }
 0x28f   : > { %v2450_v19 = vpop.permute.xlu1 %2449 }
 0x290   : > { %2452 = vst.msk [vmem:[#allocation3 + $0x8] sm:$0xff] %vm1775_vm9, %v2450_v19 }
 0x297   : > { %v2454_v20 = vld [vmem:[#allocation3 + $0x8] sm:$0xff] }
 0x298   : > { %v2462_v21 = vadd.f32 %v2459_v4, %v2454_v20 }
 0x29a   : > { %v2464_v25 = vmax.f32 %v2462_v21, 0.0 }
 0x29c   : > { %v2465_v27 = vadd.f32 %v2464_v25, %v2463_v7  ;;  %v2491_v28 = vmul.f32 %v3343_v22, %v2464_v25 }
 0x29e   : > { %v2495_v23 = vadd.f32 %v2493_v26, %v2491_v28  ;;  %2466 = vadd.xlane.f32.xlu1 %v2465_v27 }
 0x2a0   : > { %2497 = vst [vmem:[%s414_s18 + $0x8] sm:$0xff] %v2495_v23  ;;  %v2499_v30 = vmul.f32 0.5, %v2495_v23  ;;  %s380_s18 = sand.u32 1, %s3397_s20  }
 0x2a1   : > { %s381_s12 = scalar_lea.vmem [#allocation5], %s380_s18  ;;  %s2518_s25 = scalar_lea.sflag [#allocation6], %s380_s18 }
 0x2a2   : > { %v2501_v31 = vmul.f32 %v2499_v30, %v2495_v23  ;;  %s2541_s13 = sshll.u32 %s381_s12, 4  ;;  %s4201_s13 = int_to_ptr.vmem [resolvable:$true] %s2541_s13 }
 0x2a3   : > { %s3345_s0 = scalar_lea.vmem %s4201_s13, 16  ;;  %p3352_p0 = scmp.lt.s32.totalorder %s4201_s13, %s3350_s14 }
 0x2a4   : > { %v2503_v24 = vsub.f32 -0.9189385, %v2501_v31  ;;  %p3346_p11 = scmp.ne.s32.totalorder %s4201_s13, %s3345_s0  ;;  %p3353_p1 = scmp.lt.s32.totalorder %s3351_s15, %s3345_s0 }
 0x2a6   : > { %v2504_v33 = vadd.f32 %v2503_v24, %v2502_v32  ;;  %p3347_p12 = pnand %p3346_p11, %p3521_p5  ;;  %p3354_p2 = por %p3353_p1, %p3352_p0 }
 0x2a8   : > { %2505 = vadd.xlane.f32.xlu0 %v2504_v33  ;;  %p3348_p13 = pneg %p3347_p12 }
 0x2aa   : > { %p3355_p3 = pnand %p3354_p2, %p3348_p13 }
 0x327   : > { %v2467_v36 = vpop.xlane.xlu1 %2466 }
 0x328   : > { %v2469_v37 = vmul.f32 0.00390625, %v2467_v36 }
 0x32a   : > { %v2471_v38 = vmul.f32 %v2470_v35, %v2469_v37 }
 0x32c   : > { %v2473_v39 = vsel %vm2472_vm11, %v2471_v38, 0.0 }
 0x32d   : > { %v2474_v61 = vrot.slane %v2473_v39, 4 }
 0x32f   : > { %v2475_v40 = vadd.f32 %v2474_v61, %v2473_v39 }
 0x331   : > { %v2476_v41 = vrot.slane %v2475_v40, 2  ;;  %v2506_v42 = vpop.xlane.xlu0 %2505 }
 0x332   : > { %v2507_v43 = vrot.slane %v2506_v42, 4 }
 0x333   : > { %v2477_v44 = vadd.f32 %v2476_v41, %v2475_v40 }
 0x334   : > { %v2508_v45 = vadd.f32 %v2507_v43, %v2506_v42 }
 0x335   : > { %v2478_v46 = vrot.slane %v2477_v44, 1 }
 0x336   : > { %v2509_v47 = vrot.slane %v2508_v45, 2 }
 0x337   : > { %v2479_v49 = vadd.f32 %v2478_v46, %v2477_v44 }
 0x338   : > { %v2510_v50 = vadd.f32 %v2509_v47, %v2508_v45 }
 0x339   : > { %v2481_v51 = vadd.f32 %v2480_v48, %v2479_v49 }
 0x33a   : > { %v2511_v52 = vrot.slane %v2510_v50, 1 }
 0x33b   : > { %2483 = vst.msk [vmem:[%s381_s12] sm:$0x1] %vm2482_vm12, %v2481_v51 }
 0x33c   : > { %v2512_v54 = vadd.f32 %v2511_v52, %v2510_v50 }
 0x33d   : > { %3358 = shalt.err (!%p3355_p3)
}
 0x33e   : > { %s3359_s12 = scalar_lea.hbm %s4199_s16, 16  ;;  %s3363_s7 = scalar_lea.hbm %s4258_s8, 32 }
 0x33f   : > { %p3360_p4 = scmp.ne.s32.totalorder %s4199_s16, %s3359_s12  ;;  %p3364_p9 = scmp.lt.s32.totalorder %s4199_s16, %s4258_s8 }
 0x340   : > { %p3365_p10 = scmp.lt.s32.totalorder %s3363_s7, %s3359_s12 }
 0x341   : > { %p3361_p7 = pnand %p3360_p4, %p3521_p5 }
 0x342   : > { %p3366_p11 = por %p3365_p10, %p3364_p9 }
 0x343   : > { %p3362_p8 = pneg %p3361_p7 }
 0x345   : > { %p3367_p12 = pnand %p3366_p11, %p3362_p8 }
 0x347   : > { %3370 = shalt.err (!%p3367_p12)
}
 0x348   : > { %3288 = dma.vmem_to_hbm [thread:$0]  (%p3521_p5), %s4201_s13, 16, %s4199_s16, %s2518_s25  }
 0x349   : > { %s4266_s15 = scalar_lea.vmem %s4259_s9, %s3535_s30 }
 0x34a   : > { %2514 = vst.msk [vmem:[%s4266_s15] sm:$0x1] %vm2513_vm10, %v2512_v54 }
 0x34b PF: > { %p3294_p13 = scmp.ge.s32.totalorder %s3405_s22, 2  ;;  %s2562_s23 = sand.u32 1, %s3393_s19  }
 0x34c   : > { %s2563_s28 = scalar_lea.sflag [#allocation6], %s2562_s23 }
 0x34d   : > { %p3291_p0 = pnand %p3294_p13, %p3525_p6 }
 0x34f   : > { %p3292_p1 = pneg %p3291_p0 }
 0x351   : > { %3388 = dma.done.wait (%p3292_p1), %s2563_s28, 16  }
 0x352   : > { %3390 = vsyncadd (%p3292_p1), %s2563_s28, 4294967280  ;;  %p24_p5 = scmp.ge.s32.totalorder %s3508_s24, 4   ;;  %s4267_s19 = smov %s3397_s20 }
 0x353   : > { %s4268_s20 = smov %s3401_s21  ;;  %s4269_s21 = smov %s3519_s27 }
 0x354   : > { %s4270_s22 = smov %s3508_s24  ;;  %26 = sbr.rel (!%p24_p5) target bundleno = 6 (0x6), region = 140 }
 0x359   :  { %2587 = vsyncpa [#allocation6], 1 }
 0x35a   :  { %2589 = vsyncpa [#allocation6 + $0x1], 1 }

</bundles_post_ra>
